<compile_context>
chip_gen: v7x
topology: tpu7x:2x2x1
jax: 0.10.0
libtpu: 0.0.40
codegen_flags: <defaults>
</compile_context>

<pallas_src>
import functools
import math

import numpy as np
import jax
import jax.numpy as jnp
from jax.experimental import pallas as pl
from jax.experimental.pallas import tpu as pltpu


# ------------------------------- fused kernel --------------------------------

def _sub_decoder_kernel(
    x_ref, z_ref, p_ref, fill1_ref, fill2_ref, b_ref,
    wqkv1_ref, wo1_ref, wq2_ref, wkv2_ref, wo2_ref, wf1_ref, wf2_ref,
    out_ref, *, hidden, ff_hidden, eps):
  f32, bf16 = jnp.float32, jnp.bfloat16
  D = hidden

  def mxu(a, w):
    # bf16 operands, f32 accumulation on the MXU (weights arrive as bf16).
    return jnp.dot(a.astype(bf16), w, preferred_element_type=f32)

  def layer_norm_all(t):
    # F.layer_norm(t, t.shape): a single mean/var over ALL elements, biased
    # variance, no affine.  Row order is irrelevant, so computing it on the
    # batch-first flattened (sb, D) view is exact.
    n = t.shape[0] * t.shape[1]
    s = jnp.sum(jnp.sum(t, axis=1, keepdims=True), axis=0, keepdims=True)
    mean = s * (1.0 / n)
    d = t - mean
    var = jnp.sum(jnp.sum(d * d, axis=1, keepdims=True),
                  axis=0, keepdims=True) * (1.0 / n)
    return d * jax.lax.rsqrt(var + eps)

  p_int = p_ref[...]          # (sb, sb) f32 0/1 head-interleave permutation

  def attention(q, k, v, fill, wo_ref, bo):
    # One block-diagonal attention over the full (sb, sb) score matrix.  The
    # additive `fill` holds -1e30 on cross-batch / cross-head entries and
    # -1e10 on masked in-head entries, so a single row softmax reproduces the
    # reference per-(batch, head) softmax exactly (cross entries underflow to
    # 0 after max subtraction).  1/sqrt(head_dim) is already folded into Wq.
    scores = jax.lax.dot_general(q.astype(bf16), k.astype(bf16),
                                 (((1,), (1,)), ((), ())),
                                 preferred_element_type=f32)       # (sb, sb)
    energy = scores + fill
    e_max = jnp.max(energy, axis=-1, keepdims=True)
    p = jnp.exp(energy - e_max)
    denom = jnp.sum(p, axis=-1, keepdims=True)
    att = p * pl.reciprocal(denom, approx=True)                    # EUP divide
    ctx = jnp.dot(att.astype(bf16), v.astype(bf16),
                  preferred_element_type=f32)                      # (sb, D)
    # Reference's permute(2,0,1,3).reshape(-1, B, F) row interleave, realized
    # as an exact f32 permutation matmul on the otherwise idle MXU.
    ctx_i = jnp.dot(p_int, ctx, preferred_element_type=f32)
    return mxu(ctx_i, wo_ref[...]) + bo                            # out proj

  # Packed biases: one (8, P) f32 tile instead of 7 separately padded DMAs.
  bqkv1 = b_ref[0:1, 0:3 * D]
  bo1   = b_ref[1:2, 0:D]
  bq2   = b_ref[2:3, 0:D]
  bkv2  = b_ref[3:4, 0:2 * D]
  bo2   = b_ref[4:5, 0:D]
  bf1   = b_ref[5:6, 0:ff_hidden]
  bf2   = b_ref[6:7, 0:D]

  x = x_ref[...]              # (sb, D) f32, batch-first rows (b*S + s)

  # ----------------- self attention + residual + layer norm ------------------
  qkv = mxu(x, wqkv1_ref[...]) + bqkv1                 # fused QKV, SSA value
  att1 = attention(qkv[:, 0:D], qkv[:, D:2 * D], qkv[:, 2 * D:3 * D],
                   fill1_ref[...], wo1_ref, bo1)
  mid1 = layer_norm_all(att1 + x)                      # dropout = identity

  # ---------------- encoder attention + residual + layer norm ----------------
  q2 = mxu(mid1, wq2_ref[...]) + bq2
  kv = mxu(z_ref[...], wkv2_ref[...]) + bkv2           # fused KV (z is bf16)
  att2 = attention(q2, kv[:, 0:D], kv[:, D:2 * D],
                   fill2_ref[...], wo2_ref, bo2)
  mid2 = layer_norm_all(att2 + mid1)

  # ---------------- position-wise FFN + residual + layer norm ----------------
  h = jnp.maximum(mxu(mid2, wf1_ref[...]) + bf1, 0.0)
  y = mxu(h, wf2_ref[...]) + bf2
  out_ref[...] = layer_norm_all(mid2 + y)


# ------------------------------ host-side glue --------------------------------

def _interleave_matrix(seq, batch, heads):
  """Batch-first realization of the reference's permute(2,0,1,3).reshape:
  head-order output row b*S + (mi*H + h) -> interleaved row b2*S + r, where
  t = (mi*B + b)*H + h, r = t // B, b2 = t % B."""
  sb = seq * batch
  m = seq // heads
  p = np.zeros((sb, sb), np.float32)
  for b in range(batch):
    for mi in range(m):
      for h in range(heads):
        src = b * seq + mi * heads + h
        t = (mi * batch + b) * heads + h
        r, b2 = t // batch, t % batch
        p[b2 * seq + r, src] = 1.0
  return jnp.asarray(p)


def _fill_mask(mask, seq, batch, heads):
  """Additive fill tensor for the block-diagonal attention on the full
  (sb, sb) score matrix: 0 on kept in-head/in-batch entries, -1e10 on the
  reference's masked_fill entries, -1e30 on cross-head / cross-batch entries
  (softmax-exact zeros after max subtraction)."""
  sb = seq * batch
  keep = (mask != 0)                                                  # (B,m,m)
  keep_full = jnp.repeat(jnp.repeat(keep, heads, axis=1), heads, axis=2)
  sidx = jnp.arange(seq)
  same_head = (sidx[:, None] % heads) == (sidx[None, :] % heads)      # (S,S)
  per_batch = jnp.where(same_head[None],
                        jnp.where(keep_full, 0.0, -1e10),
                        -1e30).astype(jnp.float32)                    # (B,S,S)
  full = jnp.full((sb, sb), -1e30, jnp.float32)
  for b in range(batch):
    full = full.at[b * seq:(b + 1) * seq, b * seq:(b + 1) * seq].set(per_batch[b])
  return full


def sub_decoder_forward(x, z, src_mask, trg_mask, params, heads=8):
  seq, batch, hidden = x.shape
  assert seq % heads == 0 and hidden % heads == 0
  # The reference's mask.view(batch, 1, -1, head_dim) broadcast onto the
  # (batch, heads, seq//heads, seq//heads) energy needs head_dim == seq//heads.
  assert hidden // heads == seq // heads
  m, hd = seq // heads, hidden // heads
  assert trg_mask.shape == (batch, m, hd) and src_mask.shape == (batch, m, hd)
  sb = seq * batch
  f32, bf16 = jnp.float32, jnp.bfloat16

  # Batch-first activations (wrapper-side transpose = XLA layout plumbing).
  x_bf = jnp.transpose(x, (1, 0, 2)).reshape(sb, hidden).astype(f32)
  z_bf = jnp.transpose(z, (1, 0, 2)).reshape(sb, hidden).astype(bf16)

  p_int = _interleave_matrix(seq, batch, heads)
  fill1 = _fill_mask(trg_mask, seq, batch, heads)
  fill2 = _fill_mask(src_mask, seq, batch, heads)

  pa, pe, pf = params["self_attn"], params["enc_attn"], params["ffn"]
  inv_scale = 1.0 / math.sqrt(hd)

  # Fold 1/sqrt(head_dim) into the Q projections (weights + biases).
  qkv_scale = jnp.concatenate([jnp.full((hidden,), inv_scale, f32),
                               jnp.ones((2 * hidden,), f32)])[None, :]
  wqkv1 = (pa["wqkv_w"] * qkv_scale).astype(bf16)
  bqkv1 = pa["wqkv_b"] * qkv_scale
  wo1, bo1 = pa["fc_w"].astype(bf16), pa["fc_b"]
  wq2, bq2 = (pe["wq_w"] * inv_scale).astype(bf16), pe["wq_b"] * inv_scale
  wkv2, bkv2 = pe["wkv_w"].astype(bf16), pe["wkv_b"]
  wo2, bo2 = pe["fc_w"].astype(bf16), pe["fc_b"]
  wf1, bf1 = pf["fc1_w"].astype(bf16), pf["fc1_b"]
  wf2, bf2 = pf["fc2_w"].astype(bf16), pf["fc2_b"]
  ff_hidden = wf1.shape[1]

  # Pack all bias vectors into a single lane-aligned f32 tile.
  pack_w = ((max(3 * hidden, ff_hidden) + 127) // 128) * 128
  biases = jnp.zeros((8, pack_w), f32)
  for i, b in enumerate([bqkv1, bo1, bq2, bkv2, bo2, bf1, bf2]):
    biases = biases.at[i, :b.shape[1]].set(b[0])

  vmem = pl.BlockSpec(memory_space=pltpu.MemorySpace.VMEM)
  out_bf = pl.pallas_call(
      functools.partial(_sub_decoder_kernel, hidden=hidden,
                        ff_hidden=ff_hidden, eps=1e-5),
      out_shape=jax.ShapeDtypeStruct((sb, hidden), f32),
      in_specs=[vmem] * 13,
      out_specs=vmem,
  )(x_bf, z_bf, p_int, fill1, fill2, biases,
    wqkv1, wo1, wq2, wkv2, wo2, wf1, wf2)

  # Batch-first -> original (seq, batch, hidden).
  return out_bf.reshape(batch, seq, hidden).transpose(1, 0, 2)


# ------------------------------ parameter init --------------------------------

def _init_linear(key, din, dout):
  kw, kb = jax.random.split(key)
  bound = 1.0 / math.sqrt(din)
  w = jax.random.uniform(kw, (din, dout), jnp.float32, -bound, bound)  # W^T
  b = jax.random.uniform(kb, (1, dout), jnp.float32, -bound, bound)
  return w, b


def init_params(key, hidden, ff_hidden):
  keys = jax.random.split(key, 10)
  wq, bq = _init_linear(keys[0], hidden, hidden)
  wk, bk = _init_linear(keys[1], hidden, hidden)
  wv, bv = _init_linear(keys[2], hidden, hidden)
  wo, bo = _init_linear(keys[3], hidden, hidden)
  self_attn = dict(wqkv_w=jnp.concatenate([wq, wk, wv], axis=1),
                   wqkv_b=jnp.concatenate([bq, bk, bv], axis=1),
                   fc_w=wo, fc_b=bo)
  wq2, bq2 = _init_linear(keys[4], hidden, hidden)
  wk2, bk2 = _init_linear(keys[5], hidden, hidden)
  wv2, bv2 = _init_linear(keys[6], hidden, hidden)
  wo2, bo2 = _init_linear(keys[7], hidden, hidden)
  enc_attn = dict(wq_w=wq2, wq_b=bq2,
                  wkv_w=jnp.concatenate([wk2, wv2], axis=1),
                  wkv_b=jnp.concatenate([bk2, bv2], axis=1),
                  fc_w=wo2, fc_b=bo2)
  w1, b1 = _init_linear(keys[8], hidden, ff_hidden)
  w2, b2 = _init_linear(keys[9], ff_hidden, hidden)
  ffn = dict(fc1_w=w1, fc1_b=b1, fc2_w=w2, fc2_b=b2)
  return dict(self_attn=self_attn, enc_attn=enc_attn, ffn=ffn)


# ----------------------------------- main --------------------------------------

if __name__ == "__main__":
  heads = 8
  batch = 2
  seq = 32          # must be divisible by heads
  hidden = 32       # hidden == seq so the reference mask broadcast is valid
  ff_hidden = 64
  head_dim = hidden // heads      # 4
  m_per_head = seq // heads       # 4

  key = jax.random.PRNGKey(0)
  k_x, k_z, k_p = jax.random.split(key, 3)
  x = jax.random.normal(k_x, (seq, batch, hidden), jnp.float32)
  z = jax.random.normal(k_z, (seq, batch, hidden), jnp.float32)

  # Masks shaped so mask.view(batch, 1, -1, head_dim) broadcasts onto the
  # (batch, heads, seq//heads, seq//heads) energy tensor.
  trg_mask = jnp.broadcast_to(
      jnp.tril(jnp.ones((m_per_head, head_dim), jnp.float32)),
      (batch, m_per_head, head_dim))
  src_mask = jnp.ones((batch, m_per_head, head_dim), jnp.float32)

  params = init_params(k_p, hidden, ff_hidden)

  fwd = jax.jit(functools.partial(sub_decoder_forward, heads=heads))
  out = fwd(x, z, src_mask, trg_mask, params)
  out = jax.block_until_ready(out)
  assert out.shape == (seq, batch, hidden)
  assert bool(jnp.all(jnp.isfinite(out)))
  print("KERNEL_OK")
</pallas_src>

<mosaic_0001>
module attributes {stable_mosaic.version = 11 : i64} {
  func.func @_sub_decoder_kernel(%arg0: memref<64x32xf32, #tpu.memory_space<vmem>>, %arg1: memref<64x32xbf16, #tpu.memory_space<vmem>>, %arg2: memref<64x64xf32, #tpu.memory_space<vmem>>, %arg3: memref<64x64xf32, #tpu.memory_space<vmem>>, %arg4: memref<64x64xf32, #tpu.memory_space<vmem>>, %arg5: memref<8x128xf32, #tpu.memory_space<vmem>>, %arg6: memref<32x96xbf16, #tpu.memory_space<vmem>>, %arg7: memref<32x32xbf16, #tpu.memory_space<vmem>>, %arg8: memref<32x32xbf16, #tpu.memory_space<vmem>>, %arg9: memref<32x64xbf16, #tpu.memory_space<vmem>>, %arg10: memref<32x32xbf16, #tpu.memory_space<vmem>>, %arg11: memref<32x64xbf16, #tpu.memory_space<vmem>>, %arg12: memref<64x32xbf16, #tpu.memory_space<vmem>>, %arg13: memref<64x32xf32, #tpu.memory_space<vmem>>) attributes {dimension_semantics = [], scalar_prefetch = 0 : i64, scratch_operands = 0 : i64, tpu.core_type = #tpu.core_type<tc>} {
    %c0 = arith.constant 0 : index
    %c0_0 = arith.constant 0 : index
    %0 = vector.load %arg2[%c0, %c0_0] : memref<64x64xf32, #tpu.memory_space<vmem>>, vector<64x64xf32>
    %c0_1 = arith.constant 0 : index
    %c0_2 = arith.constant 0 : index
    %1 = vector.load %arg5[%c0_1, %c0_2] : memref<8x128xf32, #tpu.memory_space<vmem>>, vector<1x96xf32>
    %c1 = arith.constant 1 : index
    %c0_3 = arith.constant 0 : index
    %2 = vector.load %arg5[%c1, %c0_3] : memref<8x128xf32, #tpu.memory_space<vmem>>, vector<1x32xf32>
    %c2 = arith.constant 2 : index
    %c0_4 = arith.constant 0 : index
    %3 = vector.load %arg5[%c2, %c0_4] : memref<8x128xf32, #tpu.memory_space<vmem>>, vector<1x32xf32>
    %c3 = arith.constant 3 : index
    %c0_5 = arith.constant 0 : index
    %4 = vector.load %arg5[%c3, %c0_5] : memref<8x128xf32, #tpu.memory_space<vmem>>, vector<1x64xf32>
    %c4 = arith.constant 4 : index
    %c0_6 = arith.constant 0 : index
    %5 = vector.load %arg5[%c4, %c0_6] : memref<8x128xf32, #tpu.memory_space<vmem>>, vector<1x32xf32>
    %c5 = arith.constant 5 : index
    %c0_7 = arith.constant 0 : index
    %6 = vector.load %arg5[%c5, %c0_7] : memref<8x128xf32, #tpu.memory_space<vmem>>, vector<1x64xf32>
    %c6 = arith.constant 6 : index
    %c0_8 = arith.constant 0 : index
    %7 = vector.load %arg5[%c6, %c0_8] : memref<8x128xf32, #tpu.memory_space<vmem>>, vector<1x32xf32>
    %c0_9 = arith.constant 0 : index
    %c0_10 = arith.constant 0 : index
    %8 = vector.load %arg0[%c0_9, %c0_10] : memref<64x32xf32, #tpu.memory_space<vmem>>, vector<64x32xf32>
    %c0_11 = arith.constant 0 : index
    %c0_12 = arith.constant 0 : index
    %9 = vector.load %arg6[%c0_11, %c0_12] : memref<32x96xbf16, #tpu.memory_space<vmem>>, vector<32x96xbf16>
    %10 = arith.truncf %8 : vector<64x32xf32> to vector<64x32xbf16>
    %cst = arith.constant dense<0.000000e+00> : vector<64x96xf32>
    %11 = tpu.matmul %10, %9, %cst {dimension_numbers = #tpu.dot_dimension_numbers<[1], [0], [0], [1], [0, 0, 1, 1], [], []>} : vector<64x32xbf16>, vector<32x96xbf16>, vector<64x96xf32> -> vector<64x96xf32>
    %12 = vector.broadcast %1 : vector<1x96xf32> to vector<64x96xf32>
    %13 = arith.addf %11, %12 : vector<64x96xf32>
    %14 = vector.extract_strided_slice %13 {offsets = [0, 0], sizes = [64, 32], strides = [1, 1]} : vector<64x96xf32> to vector<64x32xf32>
    %15 = vector.extract_strided_slice %13 {offsets = [0, 32], sizes = [64, 32], strides = [1, 1]} : vector<64x96xf32> to vector<64x32xf32>
    %16 = vector.extract_strided_slice %13 {offsets = [0, 64], sizes = [64, 32], strides = [1, 1]} : vector<64x96xf32> to vector<64x32xf32>
    %c0_13 = arith.constant 0 : index
    %c0_14 = arith.constant 0 : index
    %17 = vector.load %arg3[%c0_13, %c0_14] : memref<64x64xf32, #tpu.memory_space<vmem>>, vector<64x64xf32>
    %18 = arith.truncf %14 : vector<64x32xf32> to vector<64x32xbf16>
    %19 = arith.truncf %15 : vector<64x32xf32> to vector<64x32xbf16>
    %cst_15 = arith.constant dense<0.000000e+00> : vector<64x64xf32>
    %20 = tpu.matmul %18, %19, %cst_15 {dimension_numbers = #tpu.dot_dimension_numbers<[1], [1], [0], [0], [0, 0, 1, 0], [], []>} : vector<64x32xbf16>, vector<64x32xbf16>, vector<64x64xf32> -> vector<64x64xf32>
    %21 = arith.addf %20, %17 : vector<64x64xf32>
    %cst_16 = arith.constant dense<0xFF800000> : vector<64xf32>
    %22 = vector.multi_reduction <maximumf>, %21, %cst_16 [1] : vector<64x64xf32> to vector<64xf32>
    %23 = vector.shape_cast %22 : vector<64xf32> to vector<64x1xf32>
    %24 = vector.broadcast %23 : vector<64x1xf32> to vector<64x64xf32>
    %25 = arith.subf %21, %24 : vector<64x64xf32>
    %26 = math.exp %25 : vector<64x64xf32>
    %cst_17 = arith.constant dense<0.000000e+00> : vector<64xf32>
    %27 = vector.multi_reduction <add>, %26, %cst_17 [1] : vector<64x64xf32> to vector<64xf32>
    %28 = vector.shape_cast %27 : vector<64xf32> to vector<64x1xf32>
    %29 = tpu.reciprocal %28 {approx = true} : vector<64x1xf32> -> vector<64x1xf32>
    %30 = vector.broadcast %29 : vector<64x1xf32> to vector<64x64xf32>
    %31 = arith.mulf %26, %30 : vector<64x64xf32>
    %32 = arith.truncf %31 : vector<64x64xf32> to vector<64x64xbf16>
    %33 = arith.truncf %16 : vector<64x32xf32> to vector<64x32xbf16>
    %cst_18 = arith.constant dense<0.000000e+00> : vector<64x32xf32>
    %34 = tpu.matmul %32, %33, %cst_18 {dimension_numbers = #tpu.dot_dimension_numbers<[1], [0], [0], [1], [0, 0, 1, 1], [], []>} : vector<64x64xbf16>, vector<64x32xbf16>, vector<64x32xf32> -> vector<64x32xf32>
    %cst_19 = arith.constant dense<0.000000e+00> : vector<64x32xf32>
    %35 = tpu.matmul %0, %34, %cst_19 {dimension_numbers = #tpu.dot_dimension_numbers<[1], [0], [0], [1], [0, 0, 1, 1], [], []>} : vector<64x64xf32>, vector<64x32xf32>, vector<64x32xf32> -> vector<64x32xf32>
    %c0_20 = arith.constant 0 : index
    %c0_21 = arith.constant 0 : index
    %36 = vector.load %arg7[%c0_20, %c0_21] : memref<32x32xbf16, #tpu.memory_space<vmem>>, vector<32x32xbf16>
    %37 = arith.truncf %35 : vector<64x32xf32> to vector<64x32xbf16>
    %cst_22 = arith.constant dense<0.000000e+00> : vector<64x32xf32>
    %38 = tpu.matmul %37, %36, %cst_22 {dimension_numbers = #tpu.dot_dimension_numbers<[1], [0], [0], [1], [0, 0, 1, 1], [], []>} : vector<64x32xbf16>, vector<32x32xbf16>, vector<64x32xf32> -> vector<64x32xf32>
    %39 = vector.broadcast %2 : vector<1x32xf32> to vector<64x32xf32>
    %40 = arith.addf %38, %39 : vector<64x32xf32>
    %41 = arith.addf %40, %8 : vector<64x32xf32>
    %cst_23 = arith.constant dense<0.000000e+00> : vector<64xf32>
    %42 = vector.multi_reduction <add>, %41, %cst_23 [1] : vector<64x32xf32> to vector<64xf32>
    %43 = vector.shape_cast %42 : vector<64xf32> to vector<64x1xf32>
    %cst_24 = arith.constant dense<0.000000e+00> : vector<1xf32>
    %44 = vector.multi_reduction <add>, %43, %cst_24 [0] : vector<64x1xf32> to vector<1xf32>
    %45 = vector.shape_cast %44 : vector<1xf32> to vector<1x1xf32>
    %cst_25 = arith.constant 4.8828125E-4 : f32
    %46 = vector.broadcast %cst_25 : f32 to vector<1x1xf32>
    %47 = arith.mulf %45, %46 : vector<1x1xf32>
    %48 = vector.broadcast %47 : vector<1x1xf32> to vector<64x32xf32>
    %49 = arith.subf %41, %48 : vector<64x32xf32>
    %50 = arith.mulf %49, %49 : vector<64x32xf32>
    %cst_26 = arith.constant dense<0.000000e+00> : vector<64xf32>
    %51 = vector.multi_reduction <add>, %50, %cst_26 [1] : vector<64x32xf32> to vector<64xf32>
    %52 = vector.shape_cast %51 : vector<64xf32> to vector<64x1xf32>
    %cst_27 = arith.constant dense<0.000000e+00> : vector<1xf32>
    %53 = vector.multi_reduction <add>, %52, %cst_27 [0] : vector<64x1xf32> to vector<1xf32>
    %54 = vector.shape_cast %53 : vector<1xf32> to vector<1x1xf32>
    %cst_28 = arith.constant 4.8828125E-4 : f32
    %55 = vector.broadcast %cst_28 : f32 to vector<1x1xf32>
    %56 = arith.mulf %54, %55 : vector<1x1xf32>
    %cst_29 = arith.constant 9.99999974E-6 : f32
    %57 = vector.broadcast %cst_29 : f32 to vector<1x1xf32>
    %58 = arith.addf %56, %57 : vector<1x1xf32>
    %59 = math.rsqrt %58 : vector<1x1xf32>
    %60 = vector.broadcast %59 : vector<1x1xf32> to vector<64x32xf32>
    %61 = arith.mulf %49, %60 : vector<64x32xf32>
    %c0_30 = arith.constant 0 : index
    %c0_31 = arith.constant 0 : index
    %62 = vector.load %arg8[%c0_30, %c0_31] : memref<32x32xbf16, #tpu.memory_space<vmem>>, vector<32x32xbf16>
    %63 = arith.truncf %61 : vector<64x32xf32> to vector<64x32xbf16>
    %cst_32 = arith.constant dense<0.000000e+00> : vector<64x32xf32>
    %64 = tpu.matmul %63, %62, %cst_32 {dimension_numbers = #tpu.dot_dimension_numbers<[1], [0], [0], [1], [0, 0, 1, 1], [], []>} : vector<64x32xbf16>, vector<32x32xbf16>, vector<64x32xf32> -> vector<64x32xf32>
    %65 = vector.broadcast %3 : vector<1x32xf32> to vector<64x32xf32>
    %66 = arith.addf %64, %65 : vector<64x32xf32>
    %c0_33 = arith.constant 0 : index
    %c0_34 = arith.constant 0 : index
    %67 = vector.load %arg1[%c0_33, %c0_34] : memref<64x32xbf16, #tpu.memory_space<vmem>>, vector<64x32xbf16>
    %c0_35 = arith.constant 0 : index
    %c0_36 = arith.constant 0 : index
    %68 = vector.load %arg9[%c0_35, %c0_36] : memref<32x64xbf16, #tpu.memory_space<vmem>>, vector<32x64xbf16>
    %cst_37 = arith.constant dense<0.000000e+00> : vector<64x64xf32>
    %69 = tpu.matmul %67, %68, %cst_37 {dimension_numbers = #tpu.dot_dimension_numbers<[1], [0], [0], [1], [0, 0, 1, 1], [], []>} : vector<64x32xbf16>, vector<32x64xbf16>, vector<64x64xf32> -> vector<64x64xf32>
    %70 = vector.broadcast %4 : vector<1x64xf32> to vector<64x64xf32>
    %71 = arith.addf %69, %70 : vector<64x64xf32>
    %72 = vector.extract_strided_slice %71 {offsets = [0, 0], sizes = [64, 32], strides = [1, 1]} : vector<64x64xf32> to vector<64x32xf32>
    %73 = vector.extract_strided_slice %71 {offsets = [0, 32], sizes = [64, 32], strides = [1, 1]} : vector<64x64xf32> to vector<64x32xf32>
    %c0_38 = arith.constant 0 : index
    %c0_39 = arith.constant 0 : index
    %74 = vector.load %arg4[%c0_38, %c0_39] : memref<64x64xf32, #tpu.memory_space<vmem>>, vector<64x64xf32>
    %75 = arith.truncf %66 : vector<64x32xf32> to vector<64x32xbf16>
    %76 = arith.truncf %72 : vector<64x32xf32> to vector<64x32xbf16>
    %cst_40 = arith.constant dense<0.000000e+00> : vector<64x64xf32>
    %77 = tpu.matmul %75, %76, %cst_40 {dimension_numbers = #tpu.dot_dimension_numbers<[1], [1], [0], [0], [0, 0, 1, 0], [], []>} : vector<64x32xbf16>, vector<64x32xbf16>, vector<64x64xf32> -> vector<64x64xf32>
    %78 = arith.addf %77, %74 : vector<64x64xf32>
    %cst_41 = arith.constant dense<0xFF800000> : vector<64xf32>
    %79 = vector.multi_reduction <maximumf>, %78, %cst_41 [1] : vector<64x64xf32> to vector<64xf32>
    %80 = vector.shape_cast %79 : vector<64xf32> to vector<64x1xf32>
    %81 = vector.broadcast %80 : vector<64x1xf32> to vector<64x64xf32>
    %82 = arith.subf %78, %81 : vector<64x64xf32>
    %83 = math.exp %82 : vector<64x64xf32>
    %cst_42 = arith.constant dense<0.000000e+00> : vector<64xf32>
    %84 = vector.multi_reduction <add>, %83, %cst_42 [1] : vector<64x64xf32> to vector<64xf32>
    %85 = vector.shape_cast %84 : vector<64xf32> to vector<64x1xf32>
    %86 = tpu.reciprocal %85 {approx = true} : vector<64x1xf32> -> vector<64x1xf32>
    %87 = vector.broadcast %86 : vector<64x1xf32> to vector<64x64xf32>
    %88 = arith.mulf %83, %87 : vector<64x64xf32>
    %89 = arith.truncf %88 : vector<64x64xf32> to vector<64x64xbf16>
    %90 = arith.truncf %73 : vector<64x32xf32> to vector<64x32xbf16>
    %cst_43 = arith.constant dense<0.000000e+00> : vector<64x32xf32>
    %91 = tpu.matmul %89, %90, %cst_43 {dimension_numbers = #tpu.dot_dimension_numbers<[1], [0], [0], [1], [0, 0, 1, 1], [], []>} : vector<64x64xbf16>, vector<64x32xbf16>, vector<64x32xf32> -> vector<64x32xf32>
    %cst_44 = arith.constant dense<0.000000e+00> : vector<64x32xf32>
    %92 = tpu.matmul %0, %91, %cst_44 {dimension_numbers = #tpu.dot_dimension_numbers<[1], [0], [0], [1], [0, 0, 1, 1], [], []>} : vector<64x64xf32>, vector<64x32xf32>, vector<64x32xf32> -> vector<64x32xf32>
    %c0_45 = arith.constant 0 : index
    %c0_46 = arith.constant 0 : index
    %93 = vector.load %arg10[%c0_45, %c0_46] : memref<32x32xbf16, #tpu.memory_space<vmem>>, vector<32x32xbf16>
    %94 = arith.truncf %92 : vector<64x32xf32> to vector<64x32xbf16>
    %cst_47 = arith.constant dense<0.000000e+00> : vector<64x32xf32>
    %95 = tpu.matmul %94, %93, %cst_47 {dimension_numbers = #tpu.dot_dimension_numbers<[1], [0], [0], [1], [0, 0, 1, 1], [], []>} : vector<64x32xbf16>, vector<32x32xbf16>, vector<64x32xf32> -> vector<64x32xf32>
    %96 = vector.broadcast %5 : vector<1x32xf32> to vector<64x32xf32>
    %97 = arith.addf %95, %96 : vector<64x32xf32>
    %98 = arith.addf %97, %61 : vector<64x32xf32>
    %cst_48 = arith.constant dense<0.000000e+00> : vector<64xf32>
    %99 = vector.multi_reduction <add>, %98, %cst_48 [1] : vector<64x32xf32> to vector<64xf32>
    %100 = vector.shape_cast %99 : vector<64xf32> to vector<64x1xf32>
    %cst_49 = arith.constant dense<0.000000e+00> : vector<1xf32>
    %101 = vector.multi_reduction <add>, %100, %cst_49 [0] : vector<64x1xf32> to vector<1xf32>
    %102 = vector.shape_cast %101 : vector<1xf32> to vector<1x1xf32>
    %cst_50 = arith.constant 4.8828125E-4 : f32
    %103 = vector.broadcast %cst_50 : f32 to vector<1x1xf32>
    %104 = arith.mulf %102, %103 : vector<1x1xf32>
    %105 = vector.broadcast %104 : vector<1x1xf32> to vector<64x32xf32>
    %106 = arith.subf %98, %105 : vector<64x32xf32>
    %107 = arith.mulf %106, %106 : vector<64x32xf32>
    %cst_51 = arith.constant dense<0.000000e+00> : vector<64xf32>
    %108 = vector.multi_reduction <add>, %107, %cst_51 [1] : vector<64x32xf32> to vector<64xf32>
    %109 = vector.shape_cast %108 : vector<64xf32> to vector<64x1xf32>
    %cst_52 = arith.constant dense<0.000000e+00> : vector<1xf32>
    %110 = vector.multi_reduction <add>, %109, %cst_52 [0] : vector<64x1xf32> to vector<1xf32>
    %111 = vector.shape_cast %110 : vector<1xf32> to vector<1x1xf32>
    %cst_53 = arith.constant 4.8828125E-4 : f32
    %112 = vector.broadcast %cst_53 : f32 to vector<1x1xf32>
    %113 = arith.mulf %111, %112 : vector<1x1xf32>
    %cst_54 = arith.constant 9.99999974E-6 : f32
    %114 = vector.broadcast %cst_54 : f32 to vector<1x1xf32>
    %115 = arith.addf %113, %114 : vector<1x1xf32>
    %116 = math.rsqrt %115 : vector<1x1xf32>
    %117 = vector.broadcast %116 : vector<1x1xf32> to vector<64x32xf32>
    %118 = arith.mulf %106, %117 : vector<64x32xf32>
    %c0_55 = arith.constant 0 : index
    %c0_56 = arith.constant 0 : index
    %119 = vector.load %arg11[%c0_55, %c0_56] : memref<32x64xbf16, #tpu.memory_space<vmem>>, vector<32x64xbf16>
    %120 = arith.truncf %118 : vector<64x32xf32> to vector<64x32xbf16>
    %cst_57 = arith.constant dense<0.000000e+00> : vector<64x64xf32>
    %121 = tpu.matmul %120, %119, %cst_57 {dimension_numbers = #tpu.dot_dimension_numbers<[1], [0], [0], [1], [0, 0, 1, 1], [], []>} : vector<64x32xbf16>, vector<32x64xbf16>, vector<64x64xf32> -> vector<64x64xf32>
    %122 = vector.broadcast %6 : vector<1x64xf32> to vector<64x64xf32>
    %123 = arith.addf %121, %122 : vector<64x64xf32>
    %cst_58 = arith.constant 0.000000e+00 : f32
    %124 = vector.broadcast %cst_58 : f32 to vector<64x64xf32>
    %125 = arith.maximumf %123, %124 : vector<64x64xf32>
    %c0_59 = arith.constant 0 : index
    %c0_60 = arith.constant 0 : index
    %126 = vector.load %arg12[%c0_59, %c0_60] : memref<64x32xbf16, #tpu.memory_space<vmem>>, vector<64x32xbf16>
    %127 = arith.truncf %125 : vector<64x64xf32> to vector<64x64xbf16>
    %cst_61 = arith.constant dense<0.000000e+00> : vector<64x32xf32>
    %128 = tpu.matmul %127, %126, %cst_61 {dimension_numbers = #tpu.dot_dimension_numbers<[1], [0], [0], [1], [0, 0, 1, 1], [], []>} : vector<64x64xbf16>, vector<64x32xbf16>, vector<64x32xf32> -> vector<64x32xf32>
    %129 = vector.broadcast %7 : vector<1x32xf32> to vector<64x32xf32>
    %130 = arith.addf %128, %129 : vector<64x32xf32>
    %131 = arith.addf %118, %130 : vector<64x32xf32>
    %cst_62 = arith.constant dense<0.000000e+00> : vector<64xf32>
    %132 = vector.multi_reduction <add>, %131, %cst_62 [1] : vector<64x32xf32> to vector<64xf32>
    %133 = vector.shape_cast %132 : vector<64xf32> to vector<64x1xf32>
    %cst_63 = arith.constant dense<0.000000e+00> : vector<1xf32>
    %134 = vector.multi_reduction <add>, %133, %cst_63 [0] : vector<64x1xf32> to vector<1xf32>
    %135 = vector.shape_cast %134 : vector<1xf32> to vector<1x1xf32>
    %cst_64 = arith.constant 4.8828125E-4 : f32
    %136 = vector.broadcast %cst_64 : f32 to vector<1x1xf32>
    %137 = arith.mulf %135, %136 : vector<1x1xf32>
    %138 = vector.broadcast %137 : vector<1x1xf32> to vector<64x32xf32>
    %139 = arith.subf %131, %138 : vector<64x32xf32>
    %140 = arith.mulf %139, %139 : vector<64x32xf32>
    %cst_65 = arith.constant dense<0.000000e+00> : vector<64xf32>
    %141 = vector.multi_reduction <add>, %140, %cst_65 [1] : vector<64x32xf32> to vector<64xf32>
    %142 = vector.shape_cast %141 : vector<64xf32> to vector<64x1xf32>
    %cst_66 = arith.constant dense<0.000000e+00> : vector<1xf32>
    %143 = vector.multi_reduction <add>, %142, %cst_66 [0] : vector<64x1xf32> to vector<1xf32>
    %144 = vector.shape_cast %143 : vector<1xf32> to vector<1x1xf32>
    %cst_67 = arith.constant 4.8828125E-4 : f32
    %145 = vector.broadcast %cst_67 : f32 to vector<1x1xf32>
    %146 = arith.mulf %144, %145 : vector<1x1xf32>
    %cst_68 = arith.constant 9.99999974E-6 : f32
    %147 = vector.broadcast %cst_68 : f32 to vector<1x1xf32>
    %148 = arith.addf %146, %147 : vector<1x1xf32>
    %149 = math.rsqrt %148 : vector<1x1xf32>
    %150 = vector.broadcast %149 : vector<1x1xf32> to vector<64x32xf32>
    %151 = arith.mulf %139, %150 : vector<64x32xf32>
    %c0_69 = arith.constant 0 : index
    %c0_70 = arith.constant 0 : index
    %152 = vector.load %arg13[%c0_69, %c0_70] : memref<64x32xf32, #tpu.memory_space<vmem>>, vector<64x32xf32>
    tpu.vector_store %arg13[%c0_69, %c0_70], %151 {strides = array<i32>} : memref<64x32xf32, #tpu.memory_space<vmem>>, vector<64x32xf32>,
    return
  }
}

</mosaic_0001>

<bundles_post_ra>
// kernel: mul.15
= control target key start
LH: loop header
LB: loop body
LE: loop exit
PB: predicated region body
PF: predicated region fallthrough
CT: control target
= control target key end

     0   :  { %s34_s0 = inlined_call_operand.vmem [shape: f32[1,96], index: 0, kind: input, shape index: {}]   ;;  %s35_s1 = inlined_call_operand.vmem [shape: f32[1,96], index: 1, kind: input, shape index: {}]   ;;  %s36_s2 = inlined_call_operand.vmem [shape: f32[1,96], index: 2, kind: output, shape index: {}]  }
   0x1   :  { %v3_v0 = vld [vmem:[%s34_s0] sm:$0x1] }
   0x2   :  { %v4_v1 = vld [vmem:[%s35_s1] sm:$0x1] }
   0x3   :  { %v7_v2 = vmul.f32 %v4_v1, %v3_v0 }
   0x5   :  { %9 = vst [vmem:[%s36_s2] sm:$0x1] %v7_v2 }

// kernel: sub_decoder_forward.1
= control target key start
LH: loop header
LB: loop body
LE: loop exit
PB: predicated region body
PF: predicated region fallthrough
CT: control target
= control target key end

     0   :  { %vm92_vm0 = vcmask 261120   ;;  %vm283_vm1 = vcmask 523264   ;;  %s2521_s27 = smov 64   ;;  %s3229_s6 = inlined_call_operand.vmem [shape: bf16[32,96], index: 6, kind: input, shape index: {}]   ;;  %s3230_s0 = inlined_call_operand.vmem [shape: f32[64,32], index: 0, kind: input, shape index: {}]   ;;  %s3231_s5 = inlined_call_operand.vmem [shape: f32[8,128], index: 5, kind: input, shape index: {}]   ;;  %s3232_s3 = inlined_call_operand.vmem [shape: f32[64,64], index: 3, kind: input, shape index: {}]   ;;  %s3233_s2 = inlined_call_operand.vmem [shape: f32[64,64], index: 2, kind: input, shape index: {}]   ;;  %s3234_s7 = inlined_call_operand.vmem [shape: bf16[32,32], index: 7, kind: input, shape index: {}]   ;;  %s3235_s9 = inlined_call_operand.vmem [shape: bf16[32,64], index: 9, kind: input, shape index: {}]   ;;  %s3236_s1 = inlined_call_operand.vmem [shape: bf16[64,32], index: 1, kind: input, shape index: {}]   ;;  %s3237_s8 = inlined_call_operand.vmem [shape: bf16[32,32], index: 8, kind: input, shape index: {}]   ;;  %s3238_s4 = inlined_call_operand.vmem [shape: f32[64,64], index: 4, kind: input, shape index: {}]   ;;  %s3239_s10 = inlined_call_operand.vmem [shape: bf16[32,32], index: 10, kind: input, shape index: {}]   ;;  %s3240_s11 = inlined_call_operand.vmem [shape: bf16[32,64], index: 11, kind: input, shape index: {}]   ;;  %s3241_s12 = inlined_call_operand.vmem [shape: bf16[64,32], index: 12, kind: input, shape index: {}]   ;;  %s3242_s13 = inlined_call_operand.vmem [shape: f32[64,32], index: 13, kind: output, shape index: {}]  }
   0x1   :  { %v2430_v0 = vld [vmem:[%s3229_s6] sm:$0xff]   ;;  %v2431_v1 = vld [vmem:[%s3229_s6 + $0x8] sm:$0xff]   ;;  %v2613_v5 = vld [vmem:[%s3230_s0 + $0x10] sm:$0xff] }
   0x2   :  { %2180 = vmatprep.subr.bf16.mxu0 %v2430_v0  ;;  %v2601_v2 = vld [vmem:[%s3230_s0] sm:$0xff]  ;;  %v2606_v3 = vld [vmem:[%s3230_s0 + $0x8] sm:$0xff]  ;;  %v2618_v6 = vld [vmem:[%s3230_s0 + $0x18] sm:$0xff] }
   0x3   :  { %2181 = vmatpush3.bf16.msra.mxu0 %v2430_v0  ;;  %v72_v4 = vpack.c.bf16 %v2606_v3, %v2601_v2  ;;  %v2623_v7 = vld [vmem:[%s3230_s0 + $0x20] sm:$0xff]  ;;  %v2628_v8 = vld [vmem:[%s3230_s0 + $0x28] sm:$0xff]  ;;  %v73_v9 = vpack.c.bf16 %v2618_v6, %v2613_v5  ;;  %v2640_v11 = vld [vmem:[%s3230_s0 + $0x30] sm:$0xff] }
   0x4   :  { %2182 = vmatprep.subr.bf16.mxu0 %v2431_v1  ;;  %v74_v10 = vpack.c.bf16 %v2628_v8, %v2623_v7  ;;  %v2645_v12 = vld [vmem:[%s3230_s0 + $0x38] sm:$0xff]  ;;  %v1985_v15 = vld [vmem:[%s3231_s5] ss:$0 sm:$0xff]  ;;  %s2520_s0 = smov 96   ;;  %v172_v45 = vld [vmem:[%s3232_s3 + $0x10] sm:$0xff] }
   0x5   :  { %2184 = vmatprep.mubr.msk.bf16.mxu0 %vm92_vm0, %v72_v4  ;;  %v75_v13 = vpack.c.bf16 %v2645_v12, %v2640_v11  ;;  %v170_v43 = vld [vmem:[%s3232_s3] sm:$0xff]  ;;  %v171_v47 = vld [vmem:[%s3232_s3 + $0x8] sm:$0xff]  ;;  %v173_v54 = vld [vmem:[%s3232_s3 + $0x18] sm:$0xff] }
   0x6   :  { %v174_v56 = vld [vmem:[%s3232_s3 + $0x20] sm:$0xff]  ;;  %v176_v60 = vld [vmem:[%s3232_s3 + $0x30] sm:$0xff]  ;;  %v175_v62 = vld [vmem:[%s3232_s3 + $0x28] sm:$0xff] }
   0x7   :  { %2183 = vmatpush3.bf16.msra.mxu0 %v2431_v1 }
   0xa   :  { %2185 = vmatmul.mubr.msk.bf16.vlgmr.msra.gmra.mrb[0].mxu0 %vm92_vm0, %v73_v9 }
   0xb   :  { %2188 = vmatprep.mubr.msk.bf16.mxu0 %vm92_vm0, %v74_v10 }
  0x12   :  { %2189 = vmatmul.mubr.msk.bf16.gmra.mrb[4].mxu0 %vm92_vm0, %v75_v13 }
  0xdd   :  { %v2186_v14 = vpop.f32.mrb[0].mxu0 }
  0xde   :  { %v139_v16 = vpop.f32.mrb[1].mxu0  ;;  %v148_v18 = vadd.f32 %v2186_v14, %v1985_v15  ;;  %v177_v14 = vld [vmem:[%s3232_s3 + $0x38] sm:$0xff] }
  0xdf   :  { %v2187_v17 = vpop.f32.mrb[2].mxu0  ;;  %v140_v21 = vadd.f32 %v1985_v15, %v139_v16 }
  0xe0   :  { %v151_v19 = vadd.f32 %v2187_v17, %v1985_v15  ;;  %v142_v20 = vpop.f32.mrb[3].mxu0 }
  0xe1   :  { %v143_v22 = vadd.f32 %v1985_v15, %v142_v20 }
  0xe2   :  { %v2653_v23 = vpack.c.bf16 %v151_v19, %v148_v18 }
  0xe3   :  { %v2655_v24 = vpack.c.bf16 %v143_v22, %v140_v21 }
  0xe5   :  { %186 = vrot.lane.b32.xlu0 %v2655_v24, %s2520_s0  ;;  %2200 = vmatprep.mubr.msk.bf16.mxu1 %vm92_vm0, %v2655_v24  ;;  %v2190_v25 = vpop.f32.mrb[4].mxu0 }
  0xe6   :  { %v164_v26 = vadd.f32 %v2190_v25, %v1985_v15  ;;  %v155_v27 = vpop.f32.mrb[5].mxu0 }
  0xe7   :  { %v156_v28 = vadd.f32 %v1985_v15, %v155_v27  ;;  %v2191_v29 = vpop.f32.mrb[6].mxu0 }
  0xe8   :  { %v167_v30 = vadd.f32 %v2191_v29, %v1985_v15  ;;  %v158_v31 = vpop.f32.mrb[7].mxu0 }
  0xe9   :  { %v159_v32 = vadd.f32 %v1985_v15, %v158_v31  ;;  %188 = vrot.lane.b32.xlu0 %v2653_v23, %s2520_s0 }
  0xea   :  { %v2663_v33 = vpack.c.bf16 %v167_v30, %v164_v26 }
  0xeb   :  { %v2665_v34 = vpack.c.bf16 %v159_v32, %v156_v28 }
  0xed   :  { %190 = vrot.lane.b32.xlu1 %v2665_v34, %s2520_s0 }
  0xf1   :  { %192 = vrot.lane.b32.xlu1 %v2663_v33, %s2520_s0 }
 0x157   :  { %v187_v35 = vpop.permute.xlu0 %186 }
 0x158   :  { %2420 = vmatprep.subr.msk.bf16.mxu1 %vm92_vm0, %v187_v35  ;;  %v207_v36 = vsel %vm92_vm0, %v187_v35, 0 }
 0x159   :  { %2193 = vmatpush3.bf16.xpose.msra.mxu1 %v207_v36 }
 0x15b   :  { %v189_v37 = vpop.permute.xlu0 %188 }
 0x15c   :  { %2421 = vmatprep.subr.msk.bf16.mxu1 %vm92_vm0, %v189_v37  ;;  %v210_v38 = vsel %vm92_vm0, %v189_v37, 0 }
 0x15f   :  { %v191_v39 = vpop.permute.xlu1 %190 }
 0x160   :  { %v213_v40 = vsel %vm92_vm0, %v191_v39, 0 }
 0x161   :  { %2195 = vmatpush3.bf16.xpose.msra.mxu1 %v210_v38 }
 0x162   :  { %2422 = vmatprep.subr.msk.bf16.mxu1 %vm92_vm0, %v191_v39 }
 0x163   :  { %v193_v41 = vpop.permute.xlu1 %192 }
 0x164   :  { %v216_v42 = vsel %vm92_vm0, %v193_v41, 0 }
 0x169   :  { %2197 = vmatpush3.bf16.xpose.msra.mxu1 %v213_v40 }
 0x16a   :  { %2423 = vmatprep.subr.msk.bf16.mxu1 %vm92_vm0, %v193_v41 }
 0x171   :  { %2199 = vmatpush3.bf16.xpose.msra.mxu1 %v216_v42 }
 0x178   :  { %2201 = vmatmul.mubr.msk.bf16.vlgmr.msra.gmra.mrb[0].mxu1 %vm92_vm0, %v2653_v23 }
 0x179   :  { %2204 = vmatprep.mubr.msk.bf16.mxu1 %vm92_vm0, %v2665_v34 }
 0x180   :  { %2205 = vmatmul.mubr.msk.bf16.gmra.mrb[4].mxu1 %vm92_vm0, %v2663_v33 }
 0x24b   :  { %v2202_v44 = vpop.f32.mrb[0].mxu1 }
 0x24c   :  { %v252_v46 = vpop.f32.mrb[1].mxu1  ;;  %v261_v51 = vadd.f32 %v2202_v44, %v172_v45 }
 0x24d   :  { %v253_v48 = vadd.f32 %v252_v46, %v170_v43  ;;  %v2203_v49 = vpop.f32.mrb[2].mxu1 }
 0x24e   :  { %v255_v50 = vpop.f32.mrb[3].mxu1  ;;  %v264_v57 = vadd.f32 %v2203_v49, %v173_v54  ;;  %v290_v59 = vsel %vm283_vm1, %v261_v51, -inf }
 0x24f   :  { %v256_v52 = vadd.f32 %v255_v50, %v171_v47  ;;  %v284_v53 = vsel %vm283_vm1, %v253_v48, -inf }
 0x250   :  { %285 = vmax.xlane.f32.xlu0 %v284_v53  ;;  %v293_v13 = vsel %vm283_vm1, %v264_v57, -inf }
 0x251   :  { %v287_v55 = vsel %vm283_vm1, %v256_v52, -inf }
 0x252   :  { %288 = vmax.xlane.f32.xlu1 %v287_v55 }
 0x253   :  { %v2206_v58 = vpop.f32.mrb[4].mxu1 }
 0x254   :  { %v268_v61 = vpop.f32.mrb[5].mxu1  ;;  %291 = vmax.xlane.f32.xlu0 %v290_v59  ;;  %v277_v4 = vadd.f32 %v2206_v58, %v176_v60 }
 0x255   :  { %v269_v63 = vadd.f32 %v268_v61, %v174_v56  ;;  %v2207_v0 = vpop.f32.mrb[6].mxu1 }
 0x256   :  { %v271_v1 = vpop.f32.mrb[7].mxu1  ;;  %v280_v15 = vadd.f32 %v2207_v0, %v177_v14  ;;  %v302_v16 = vsel %vm283_vm1, %v277_v4, -inf }
 0x257   :  { %v272_v9 = vadd.f32 %v271_v1, %v175_v62  ;;  %v296_v10 = vsel %vm283_vm1, %v269_v63, -inf }
 0x258   :  { %297 = vmax.xlane.f32.xlu1 %v296_v10  ;;  %294 = vmax.xlane.f32.xlu0 %v293_v13  ;;  %v305_v18 = vsel %vm283_vm1, %v280_v15, -inf }
 0x259   :  { %v299_v17 = vsel %vm283_vm1, %v272_v9, -inf }
 0x25c   :  { %303 = vmax.xlane.f32.xlu1 %v302_v16  ;;  %300 = vmax.xlane.f32.xlu0 %v299_v17 }
 0x260   :  { %306 = vmax.xlane.f32.xlu0 %v305_v18 }
 0x26d   :  { %376 = vrot.lane.b32.xlu1 %v2655_v24, %s2521_s27 }
 0x2dd   :  { %v286_v19 = vpop.xlane.xlu0 %285 }
 0x2de   :  { %v308_v20 = vsub.f32 %v253_v48, %v286_v19 }
 0x2df   :  { %v289_v21 = vpop.xlane.xlu1 %288 }
 0x2e0   :  { %v316_v26 = vmul.f32 1.442695, %v308_v20  ;;  %v309_v28 = vsub.f32 %v256_v52, %v289_v21 }
 0x2e1   :  { %v292_v22 = vpop.xlane.xlu0 %291 }
 0x2e2   :  { %v310_v25 = vsub.f32 %v261_v51, %v292_v22  ;;  %v318_v36 = vmul.f32 1.442695, %v309_v28 }
 0x2e4   :  { %v320_v27 = vmul.f32 1.442695, %v310_v25 }
 0x2e5   :  { %v298_v29 = vpop.xlane.xlu1 %297  ;;  %v295_v30 = vpop.xlane.xlu0 %294 }
 0x2e6   :  { %2450 = vpow2.f32 %v320_v27  ;;  %v311_v31 = vsub.f32 %v264_v57, %v295_v30  ;;  %v312_v32 = vsub.f32 %v269_v63, %v298_v29 }
 0x2e7   :  { %2452 = vpow2.f32 %v316_v26 }
 0x2e8   :  { %v322_v35 = vmul.f32 1.442695, %v311_v31  ;;  %v324_v24 = vmul.f32 1.442695, %v312_v32 }
 0x2e9   :  { %v304_v37 = vpop.xlane.xlu1 %303  ;;  %v301_v38 = vpop.xlane.xlu0 %300 }
 0x2ea   :  { %v314_v39 = vsub.f32 %v277_v4, %v304_v37  ;;  %2454 = vpow2.f32 %v322_v35  ;;  %v313_v41 = vsub.f32 %v272_v9, %v301_v38 }
 0x2eb   :  { %2456 = vpow2.f32 %v318_v36 }
 0x2ec   :  { %v328_v40 = vmul.f32 1.442695, %v314_v39  ;;  %v326_v47 = vmul.f32 1.442695, %v313_v41  ;;  %v2748_v39 = vld [vmem:[%s3233_s2] sm:$0xff] }
 0x2ed   :  { %v377_v42 = vpop.permute.xlu1 %376  ;;  %v307_v43 = vpop.xlane.xlu0 %306 }
 0x2ee   :  { %2458 = vpow2.f32 %v328_v40  ;;  %v315_v44 = vsub.f32 %v280_v15, %v307_v43  ;;  %2208 = vmatprep.subr.bf16.mxu0 %v377_v42 }
 0x2ef   :  { %2209 = vmatpush3.bf16.msra.mxu0 %v377_v42  ;;  %2460 = vpow2.f32 %v324_v24  ;;  %v2432_v24 = vld [vmem:[%s3234_s7] sm:$0xff]  }
 0x2f0   :  { %v2719_v45 = vpop.eup %2450  ;;  %v330_v46 = vmul.f32 1.442695, %v315_v44  ;;  %2252 = vmatprep.subr.bf16.mxu1 %v2432_v24 }
 0x2f1   :  { %v338_v48 = vsel %vm283_vm1, %v2719_v45, 0.0  ;;  %v2453_v49 = vpop.eup %2452  ;;  %2253 = vmatpush3.bf16.msra.mxu1 %v2432_v24 }
 0x2f2   :  { %2462 = vpow2.f32 %v330_v46  ;;  %339 = vadd.xlane.f32.xlu1 %v338_v48  ;;  %v332_v51 = vsel %vm283_vm1, %v2453_v49, 0.0 }
 0x2f3   :  { %2464 = vpow2.f32 %v326_v47 }
 0x2f4   :  { %v2455_v50 = vpop.eup %2454 }
 0x2f5   :  { %v341_v52 = vsel %vm283_vm1, %v2455_v50, 0.0  ;;  %v2457_v53 = vpop.eup %2456 }
 0x2f6   :  { %333 = vadd.xlane.f32.xlu1 %v332_v51  ;;  %342 = vadd.xlane.f32.xlu0 %v341_v52  ;;  %v335_v57 = vsel %vm283_vm1, %v2457_v53, 0.0  ;;  %v2758_v52 = vld [vmem:[%s3233_s2 + $0x8] sm:$0xff] }
 0x2f8   :  { %v2725_v54 = vpop.eup %2458 }
 0x2f9   :  { %v350_v55 = vsel %vm283_vm1, %v2725_v54, 0.0  ;;  %v2461_v56 = vpop.eup %2460 }
 0x2fa   :  { %351 = vadd.xlane.f32.xlu1 %v350_v55  ;;  %336 = vadd.xlane.f32.xlu0 %v335_v57  ;;  %v344_v59 = vsel %vm283_vm1, %v2461_v56, 0.0  ;;  %v2777_v55 = vld [vmem:[%s3233_s2 + $0x20] sm:$0xff]  ;;  %v2791_v57 = vld [vmem:[%s3233_s2 + $0x30] sm:$0xff] }
 0x2fc   :  { %v2463_v58 = vpop.eup %2462 }
 0x2fd   :  { %v353_v60 = vsel %vm283_vm1, %v2463_v58, 0.0  ;;  %v2465_v61 = vpop.eup %2464 }
 0x2fe   :  { %345 = vadd.xlane.f32.xlu1 %v344_v59  ;;  %354 = vadd.xlane.f32.xlu0 %v353_v60  ;;  %v347_v62 = vsel %vm283_vm1, %v2465_v61, 0.0  ;;  %v2433_v59 = vld [vmem:[%s3234_s7 + $0x8] sm:$0xff]  }
 0x2ff   :  { %2254 = vmatprep.subr.bf16.mxu1 %v2433_v59 }
 0x300   :  { %2255 = vmatpush3.bf16.msra.mxu1 %v2433_v59 }
 0x302   :  { %348 = vadd.xlane.f32.xlu0 %v347_v62 }
 0x30f   :  { %380 = vrot.lane.b32.xlu1 %v2665_v34, %s2521_s27 }
 0x313   :  { %382 = vrot.lane.b32.xlu1 %v2663_v33, %s2521_s27 }
 0x318   :  { %378 = vrot.lane.b32.xlu0 %v2653_v23, %s2521_s27 }
 0x37f   :  { %v340_v63 = vpop.xlane.xlu1 %339 }
 0x383   :  { %v334_v0 = vpop.xlane.xlu1 %333  ;;  %v343_v1 = vpop.xlane.xlu0 %342 }
 0x384   :  { %2466 = vrcp.f32 %v334_v0 }
 0x387   :  { %v352_v4 = vpop.xlane.xlu1 %351  ;;  %v337_v9 = vpop.xlane.xlu0 %336 }
 0x388   :  { %2468 = vrcp.f32 %v337_v9 }
 0x389   :  { %2470 = vrcp.f32 %v343_v1 }
 0x38a   :  { %2472 = vrcp.f32 %v340_v63 }
 0x38b   :  { %v355_v10 = vpop.xlane.xlu0 %354  ;;  %v346_v13 = vpop.xlane.xlu1 %345 }
 0x38c   :  { %2474 = vrcp.f32 %v346_v13 }
 0x38e   :  { %v2467_v34 = vpop.eup %2466 }
 0x38f   :  { %v349_v14 = vpop.xlane.xlu0 %348  ;;  %v381_v33 = vpop.permute.xlu1 %380  ;;  %v364_v17 = vmul.f32 %v2467_v34, %v2453_v49 }
 0x390   :  { %2476 = vrcp.f32 %v349_v14 }
 0x391   :  { %2478 = vrcp.f32 %v355_v10 }
 0x392   :  { %v2469_v15 = vpop.eup %2468  ;;  %2480 = vrcp.f32 %v352_v4 }
 0x393   :  { %v379_v16 = vpop.permute.xlu0 %378  ;;  %v365_v23 = vmul.f32 %v2469_v15, %v2457_v53  ;;  %v2471_v19 = vpop.eup %2470  ;;  %v2763_v53 = vld [vmem:[%s3233_s2 + $0x10] sm:$0xff]  ;;  %v2008_v15 = vld [vmem:[%s3231_s5 + $0x1] ss:$0 sm:$0xff] }
 0x394   :  { %2210 = vmatprep.subr.bf16.mxu0 %v379_v16  ;;  %v2473_v20 = vpop.eup %2472  ;;  %v383_v22 = vpop.permute.xlu1 %382  ;;  %v367_v26 = vmul.f32 %v2471_v19, %v2455_v50 }
 0x395   :  { %2211 = vmatpush3.bf16.msra.mxu0 %v379_v16  ;;  %v372_v18 = vpack.c.bf16 %v365_v23, %v364_v17  ;;  %v366_v28 = vmul.f32 %v2473_v20, %v2719_v45 }
 0x396   :  { %2212 = vmatprep.subr.bf16.mxu0 %v381_v33  ;;  %v2475_v21 = vpop.eup %2474 }
 0x397   :  { %2216 = vmatprep.mubr.msk.bf16.mxu0 %vm283_vm1, %v372_v18  ;;  %v368_v29 = vmul.f32 %v2475_v21, %v2461_v56  ;;  %v373_v30 = vpack.c.bf16 %v367_v26, %v366_v28  ;;  %v2786_v56 = vld [vmem:[%s3233_s2 + $0x28] sm:$0xff] }
 0x399   :  { %2213 = vmatpush3.bf16.msra.mxu0 %v381_v33 }
 0x39a   :  { %v2477_v25 = vpop.eup %2476  ;;  %2214 = vmatprep.subr.bf16.mxu0 %v383_v22 }
 0x39b   :  { %v369_v27 = vmul.f32 %v2477_v25, %v2465_v61  ;;  %v2479_v31 = vpop.eup %2478 }
 0x39c   :  { %v2481_v35 = vpop.eup %2480  ;;  %v371_v36 = vmul.f32 %v2479_v31, %v2463_v58  ;;  %v2800_v58 = vld [vmem:[%s3233_s2 + $0x38] sm:$0xff] }
 0x39d   :  { %2215 = vmatpush3.bf16.msra.mxu0 %v383_v22  ;;  %v374_v32 = vpack.c.bf16 %v369_v27, %v368_v29  ;;  %v370_v37 = vmul.f32 %v2481_v35, %v2725_v54  ;;  %v2772_v54 = vld [vmem:[%s3233_s2 + $0x18] sm:$0xff] }
 0x39f   :  { %v375_v38 = vpack.c.bf16 %v371_v36, %v370_v37 }
 0x3a0   :  { %2217 = vmatmul.mubr.msk.bf16.vlgmr.msra.gmra.mrb[8].mxu0 %vm283_vm1, %v373_v30 }
 0x3a1   :  { %2220 = vmatprep.mubr.msk.bf16.mxu0 %vm283_vm1, %v374_v32 }
 0x3a8   :  { %2221 = vmatmul.mubr.msk.bf16.gmra.mrb[12].mxu0 %vm283_vm1, %v375_v38 }
 0x3a9   :  { %2240 = vmatprep.mubr.msk.f32.mxu0 %vm283_vm1, %v2748_v39 }
 0x473   :  { %v2218_v40 = vpop.f32.mrb[8].mxu0 }
 0x474   :  { %v434_v41 = vpop.f32.mrb[9].mxu0 }
 0x475   :  { %v2219_v42 = vpop.f32.mrb[10].mxu0 }
 0x476   :  { %v2392_v43 = vpack.c.bf16 %v2219_v42, %v2218_v40  ;;  %v437_v44 = vpop.f32.mrb[11].mxu0 }
 0x477   :  { %v2388_v45 = vpack.c.bf16 %v437_v44, %v434_v41 }
 0x479   :  { %2389 = vmatprep.subr.bf16.mxu0 %v2388_v45 }
 0x47a   :  { %2391 = vmatpush3.bf16.msra.mxu0 %v2388_v45  ;;  %v2434_v45 = vld [vmem:[%s3235_s9] sm:$0xff]  }
 0x47b   :  { %v2222_v46 = vpop.f32.mrb[12].mxu0  ;;  %2393 = vmatprep.subr.bf16.mxu0 %v2392_v43  ;;  %2276 = vmatprep.subr.bf16.mxu1 %v2434_v45 }
 0x47c   :  { %v450_v47 = vpop.f32.mrb[13].mxu0 }
 0x47d   :  { %v2223_v48 = vpop.f32.mrb[14].mxu0 }
 0x47e   :  { %v2400_v49 = vpack.c.bf16 %v2223_v48, %v2222_v46  ;;  %v453_v50 = vpop.f32.mrb[15].mxu0  ;;  %2395 = vmatpush3.bf16.msra.mxu0 %v2392_v43 }
 0x47f   :  { %v2396_v51 = vpack.c.bf16 %v453_v50, %v450_v47 }
 0x481   :  { %2397 = vmatprep.subr.bf16.mxu0 %v2396_v51 }
 0x482   :  { %2399 = vmatpush3.bf16.msra.mxu0 %v2396_v51 }
 0x483   :  { %2401 = vmatprep.subr.bf16.mxu0 %v2400_v49 }
 0x486   :  { %2403 = vmatpush3.bf16.msra.mxu0 %v2400_v49 }
 0x489   :  { %2241 = vmatmul.mubr.msk.f32.vlgmr.msra.gmra.mrb[16].mxu0 %vm283_vm1, %v2758_v52 }
 0x48a   :  { %2243 = vmatprep.mubr.msk.f32.mxu0 %vm283_vm1, %v2763_v53 }
 0x48d   :  { %2244 = vmatmul.mubr.msk.f32.gmra.mrb[18].mxu0 %vm283_vm1, %v2772_v54 }
 0x48e   :  { %2246 = vmatprep.mubr.msk.f32.mxu0 %vm283_vm1, %v2777_v55 }
 0x491   :  { %2247 = vmatmul.mubr.msk.f32.gmra.mrb[20].mxu0 %vm283_vm1, %v2786_v56 }
 0x492   :  { %2249 = vmatprep.mubr.msk.f32.mxu0 %vm283_vm1, %v2791_v57 }
 0x495   :  { %2250 = vmatmul.mubr.msk.f32.gmra.mrb[22].mxu0 %vm283_vm1, %v2800_v58 }
 0x55c   :  { %v2242_v60 = vpop.f32.mrb[16].mxu0 }
 0x55d   :  { %v555_v61 = vpop.f32.mrb[17].mxu0 }
 0x55e   :  { %v598_v62 = vpack.c.bf16 %v2242_v60, %v555_v61 }
 0x560   :  { %v2245_v63 = vpop.f32.mrb[18].mxu0  ;;  %2256 = vmatprep.mubr.msk.bf16.mxu1 %vm92_vm0, %v598_v62 }
 0x561   :  { %v565_v0 = vpop.f32.mrb[19].mxu0 }
 0x562   :  { %v599_v1 = vpack.c.bf16 %v2245_v63, %v565_v0 }
 0x564   :  { %2257 = vmatmul.mubr.msk.bf16.vlgmr.msra.gmra.mrb[8].mxu1 %vm92_vm0, %v599_v1  ;;  %v2248_v4 = vpop.f32.mrb[20].mxu0 }
 0x565   :  { %v575_v9 = vpop.f32.mrb[21].mxu0  ;;  %2277 = vmatpush3.bf16.msra.mxu1 %v2434_v45 }
 0x566   :  { %v600_v10 = vpack.c.bf16 %v2248_v4, %v575_v9 }
 0x568   :  { %v2251_v13 = vpop.f32.mrb[22].mxu0  ;;  %2260 = vmatprep.mubr.msk.bf16.mxu1 %vm92_vm0, %v600_v10 }
 0x569   :  { %v585_v14 = vpop.f32.mrb[23].mxu0 }
 0x56a   :  { %v601_v34 = vpack.c.bf16 %v2251_v13, %v585_v14 }
 0x56c   :  { %2261 = vmatmul.mubr.msk.bf16.gmra.mrb[12].mxu1 %vm92_vm0, %v601_v34 }
 0x637   :  { %v2258_v33 = vpop.f32.mrb[8].mxu1 }
 0x638   :  { %v664_v16 = vpop.f32.mrb[9].mxu1  ;;  %v673_v17 = vadd.f32 %v2258_v33, %v2008_v15 }
 0x639   :  { %v665_v23 = vadd.f32 %v2008_v15, %v664_v16  ;;  %v2259_v18 = vpop.f32.mrb[10].mxu1 }
 0x63a   :  { %v667_v19 = vpop.f32.mrb[11].mxu1  ;;  %v676_v22 = vadd.f32 %v2259_v18, %v2008_v15  ;;  %v697_v27 = vadd.f32 %v673_v17, %v2613_v5 }
 0x63b   :  { %v668_v20 = vadd.f32 %v2008_v15, %v667_v19  ;;  %v695_v21 = vadd.f32 %v665_v23, %v2601_v2 }
 0x63c   :  { %v698_v31 = vadd.f32 %v676_v22, %v2618_v6  ;;  %v709_v2 = vsel %vm92_vm0, %v697_v27, 0.0 }
 0x63d   :  { %v703_v25 = vsel %vm92_vm0, %v695_v21, 0.0  ;;  %v696_v26 = vadd.f32 %v668_v20, %v2606_v3 }
 0x63e   :  { %704 = vadd.xlane.f32.xlu0 %v703_v25  ;;  %v712_v5 = vsel %vm92_vm0, %v698_v31, 0.0 }
 0x63f   :  { %v2262_v28 = vpop.f32.mrb[12].mxu1  ;;  %v706_v29 = vsel %vm92_vm0, %v696_v26, 0.0 }
 0x640   :  { %707 = vadd.xlane.f32.xlu1 %v706_v29  ;;  %v680_v30 = vpop.f32.mrb[13].mxu1  ;;  %v689_v32 = vadd.f32 %v2262_v28, %v2008_v15 }
 0x641   :  { %v681_v35 = vadd.f32 %v2008_v15, %v680_v30  ;;  %v2263_v36 = vpop.f32.mrb[14].mxu1 }
 0x642   :  { %710 = vadd.xlane.f32.xlu0 %v709_v2  ;;  %v683_v37 = vpop.f32.mrb[15].mxu1  ;;  %v692_v24 = vadd.f32 %v2263_v36, %v2008_v15  ;;  %v701_v42 = vadd.f32 %v689_v32, %v2640_v11 }
 0x643   :  { %v684_v38 = vadd.f32 %v2008_v15, %v683_v37  ;;  %v699_v3 = vadd.f32 %v681_v35, %v2623_v7 }
 0x644   :  { %v721_v43 = vsel %vm92_vm0, %v701_v42, 0.0  ;;  %v702_v44 = vadd.f32 %v692_v24, %v2645_v12  ;;  %v2436_v24 = vld [vmem:[%s3236_s1] sm:$0xff]  }
 0x645   :  { %v715_v40 = vsel %vm92_vm0, %v699_v3, 0.0  ;;  %v700_v41 = vadd.f32 %v684_v38, %v2628_v8  ;;  %2280 = vmatprep.mubr.msk.bf16.mxu1 %vm92_vm0, %v2436_v24 }
 0x646   :  { %713 = vadd.xlane.f32.xlu0 %v712_v5  ;;  %716 = vadd.xlane.f32.xlu1 %v715_v40  ;;  %v724_v7 = vsel %vm92_vm0, %v702_v44, 0.0  ;;  %v2435_v5 = vld [vmem:[%s3235_s9 + $0x8] sm:$0xff]  }
 0x647   :  { %v718_v6 = vsel %vm92_vm0, %v700_v41, 0.0  ;;  %2278 = vmatprep.subr.bf16.mxu1 %v2435_v5  ;;  %v2437_v40 = vld [vmem:[%s3236_s1 + $0x8] sm:$0xff]  }
 0x648   :  { %2279 = vmatpush3.bf16.msra.mxu1 %v2435_v5 }
 0x64a   :  { %719 = vadd.xlane.f32.xlu0 %v718_v6  ;;  %722 = vadd.xlane.f32.xlu1 %v721_v43  ;;  %v2440_v6 = vld [vmem:[%s3237_s8] sm:$0xff]   ;;  %v2441_v43 = vld [vmem:[%s3237_s8 + $0x8] sm:$0xff]  }
 0x64b   :  { %2281 = vmatmul.mubr.msk.bf16.vlgmr.msra.gmra.mrb[16].mxu1 %vm92_vm0, %v2437_v40  ;;  %2264 = vmatprep.subr.bf16.mxu0 %v2440_v6 }
 0x64c   :  { %2265 = vmatpush3.bf16.msra.mxu0 %v2440_v6 }
 0x64d   :  { %2266 = vmatprep.subr.bf16.mxu0 %v2441_v43 }
 0x64e   :  { %725 = vadd.xlane.f32.xlu0 %v724_v7 }
 0x650   :  { %2267 = vmatpush3.bf16.msra.mxu0 %v2441_v43 }
 0x6cb   :  { %v705_v8 = vpop.xlane.xlu0 %704 }
 0x6cd   :  { %v708_v11 = vpop.xlane.xlu1 %707 }
 0x6ce   :  { %v727_v46 = vadd.f32 %v708_v11, %v705_v8 }
 0x6cf   :  { %v711_v47 = vpop.xlane.xlu0 %710 }
 0x6d0   :  { %v728_v48 = vadd.f32 %v727_v46, %v711_v47 }
 0x6d3   :  { %v714_v49 = vpop.xlane.xlu0 %713  ;;  %v717_v50 = vpop.xlane.xlu1 %716 }
 0x6d4   :  { %v729_v51 = vadd.f32 %v728_v48, %v714_v49 }
 0x6d6   :  { %v730_v12 = vadd.f32 %v729_v51, %v717_v50 }
 0x6d7   :  { %v720_v59 = vpop.xlane.xlu0 %719  ;;  %v723_v61 = vpop.xlane.xlu1 %722 }
 0x6d8   :  { %v731_v60 = vadd.f32 %v730_v12, %v720_v59 }
 0x6da   :  { %v732_v62 = vadd.f32 %v731_v60, %v723_v61 }
 0x6db   :  { %v726_v63 = vpop.xlane.xlu0 %725 }
 0x6dc   :  { %v733_v0 = vadd.f32 %v732_v62, %v726_v63 }
 0x6de   :  { %v734_v1 = vrot.slane %v733_v0, 4 }
 0x6e0   :  { %v735_v4 = vadd.f32 %v734_v1, %v733_v0 }
 0x6e2   :  { %v736_v9 = vrot.slane %v735_v4, 2 }
 0x6e4   :  { %v737_v10 = vadd.f32 %v736_v9, %v735_v4 }
 0x6e6   :  { %v738_v13 = vrot.slane %v737_v10, 1 }
 0x6e8   :  { %v739_v14 = vadd.f32 %v738_v13, %v737_v10 }
 0x6ea   :  { %v740_v34 = vmul.f32 0.00048828125, %v739_v14 }
 0x6ec   :  { %v2833_v15 = vsub.f32 %v696_v26, %v740_v34  ;;  %v2835_v33 = vsub.f32 %v695_v21, %v740_v34  ;;  %v2837_v16 = vsub.f32 %v698_v31, %v740_v34  ;;  %v2839_v17 = vsub.f32 %v697_v27, %v740_v34 }
 0x6ed   :  { %v2845_v19 = vsub.f32 %v700_v41, %v740_v34  ;;  %v2847_v20 = vsub.f32 %v699_v3, %v740_v34  ;;  %v2855_v27 = vsub.f32 %v702_v44, %v740_v34  ;;  %v2857_v28 = vsub.f32 %v701_v42, %v740_v34  ;;  %v2438_v41 = vld [vmem:[%s3236_s1 + $0x10] sm:$0xff]   ;;  %v2439_v42 = vld [vmem:[%s3236_s1 + $0x18] sm:$0xff]  }
 0x6ee   :  { %v750_v23 = vmul.f32 %v2833_v15, %v2833_v15  ;;  %v749_v18 = vmul.f32 %v2835_v33, %v2835_v33  ;;  %v752_v21 = vmul.f32 %v2837_v16, %v2837_v16  ;;  %v751_v26 = vmul.f32 %v2839_v17, %v2839_v17  ;;  %2284 = vmatprep.mubr.msk.bf16.mxu1 %vm92_vm0, %v2438_v41 }
 0x6ef   :  { %v754_v31 = vmul.f32 %v2845_v19, %v2845_v19  ;;  %v753_v32 = vmul.f32 %v2847_v20, %v2847_v20  ;;  %v756_v2 = vmul.f32 %v2855_v27, %v2855_v27  ;;  %v755_v37 = vmul.f32 %v2857_v28, %v2857_v28  ;;  %2285 = vmatmul.mubr.msk.bf16.gmra.mrb[20].mxu1 %vm92_vm0, %v2439_v42 }
 0x6f0   :  { %v760_v22 = vsel %vm92_vm0, %v750_v23, 0.0  ;;  %v757_v25 = vsel %vm92_vm0, %v749_v18, 0.0  ;;  %v766_v29 = vsel %vm92_vm0, %v752_v21, 0.0  ;;  %v763_v30 = vsel %vm92_vm0, %v751_v26, 0.0 }
 0x6f1   :  { %761 = vadd.xlane.f32.xlu0 %v760_v22  ;;  %758 = vadd.xlane.f32.xlu1 %v757_v25  ;;  %v772_v35 = vsel %vm92_vm0, %v754_v31, 0.0  ;;  %v769_v36 = vsel %vm92_vm0, %v753_v32, 0.0  ;;  %v778_v38 = vsel %vm92_vm0, %v756_v2, 0.0  ;;  %v775_v3 = vsel %vm92_vm0, %v755_v37, 0.0 }
 0x6f5   :  { %767 = vadd.xlane.f32.xlu0 %v766_v29  ;;  %764 = vadd.xlane.f32.xlu1 %v763_v30 }
 0x6f9   :  { %773 = vadd.xlane.f32.xlu0 %v772_v35  ;;  %770 = vadd.xlane.f32.xlu1 %v769_v36 }
 0x6fd   :  { %779 = vadd.xlane.f32.xlu0 %v778_v38  ;;  %776 = vadd.xlane.f32.xlu1 %v775_v3 }
 0x71e   :  { %v2282_v29 = vpop.f32.mrb[16].mxu1 }
 0x71f   :  { %v1000_v31 = vpop.f32.mrb[17].mxu1 }
 0x720   :  { %v2283_v35 = vpop.f32.mrb[18].mxu1 }
 0x77e   :  { %v762_v44 = vpop.xlane.xlu0 %761  ;;  %v759_v7 = vpop.xlane.xlu1 %758 }
 0x77f   :  { %v781_v45 = vadd.f32 %v762_v44, %v759_v7 }
 0x782   :  { %v768_v8 = vpop.xlane.xlu0 %767  ;;  %v765_v11 = vpop.xlane.xlu1 %764 }
 0x783   :  { %v782_v46 = vadd.f32 %v781_v45, %v765_v11 }
 0x785   :  { %v783_v47 = vadd.f32 %v782_v46, %v768_v8 }
 0x786   :  { %v774_v48 = vpop.xlane.xlu0 %773  ;;  %v771_v49 = vpop.xlane.xlu1 %770 }
 0x787   :  { %v784_v50 = vadd.f32 %v783_v47, %v771_v49  ;;  %v2015_v47 = vld [vmem:[%s3231_s5 + $0x2] ss:$0 sm:$0xff] }
 0x789   :  { %v785_v51 = vadd.f32 %v784_v50, %v774_v48 }
 0x78a   :  { %v777_v12 = vpop.xlane.xlu1 %776  ;;  %v780_v60 = vpop.xlane.xlu0 %779 }
 0x78b   :  { %v786_v59 = vadd.f32 %v785_v51, %v777_v12 }
 0x78d   :  { %v787_v61 = vadd.f32 %v786_v59, %v780_v60 }
 0x78f   :  { %v788_v62 = vrot.slane %v787_v61, 4 }
 0x791   :  { %v789_v63 = vadd.f32 %v788_v62, %v787_v61 }
 0x793   :  { %v790_v0 = vrot.slane %v789_v63, 2 }
 0x795   :  { %v791_v1 = vadd.f32 %v790_v0, %v789_v63 }
 0x797   :  { %v792_v4 = vrot.slane %v791_v1, 1 }
 0x799   :  { %v793_v9 = vadd.f32 %v792_v4, %v791_v1 }
 0x79b   :  { %v794_v10 = vmul.f32 0.00048828125, %v793_v9 }
 0x79d   :  { %v795_v13 = vadd.f32 1e-05, %v794_v10 }
 0x79f   :  { %2482 = vrsqrt.f32 %v795_v13 }
 0x7a9   :  { %v2483_v14 = vpop.eup %2482 }
 0x7aa   :  { %v2899_v34 = vmul.f32 %v2483_v14, %v2835_v33  ;;  %v2902_v23 = vmul.f32 %v2483_v14, %v2833_v15  ;;  %v2905_v18 = vmul.f32 %v2483_v14, %v2839_v17  ;;  %v2908_v22 = vmul.f32 %v2483_v14, %v2837_v16 }
 0x7ab   :  { %v2911_v25 = vmul.f32 %v2483_v14, %v2847_v20  ;;  %v2914_v21 = vmul.f32 %v2483_v14, %v2845_v19  ;;  %v2926_v16 = vmul.f32 %v2483_v14, %v2857_v28  ;;  %v2929_v17 = vmul.f32 %v2483_v14, %v2855_v27  ;;  %v2022_v20 = vld [vmem:[%s3231_s5 + $0x3] ss:$0 sm:$0xff]  ;;  %v1003_v28 = vpop.f32.mrb[19].mxu1 }
 0x7ac   :  { %v809_v26 = vpack.c.bf16 %v2902_v23, %v2899_v34  ;;  %v810_v33 = vpack.c.bf16 %v2908_v22, %v2905_v18  ;;  %v1009_v30 = vadd.f32 %v2282_v29, %v2022_v20  ;;  %v1001_v32 = vadd.f32 %v2022_v20, %v1000_v31 }
 0x7ad   :  { %v811_v15 = vpack.c.bf16 %v2914_v21, %v2911_v25  ;;  %v812_v19 = vpack.c.bf16 %v2929_v17, %v2926_v16  ;;  %v1012_v36 = vadd.f32 %v2283_v35, %v2022_v20  ;;  %v1004_v2 = vadd.f32 %v2022_v20, %v1003_v28  ;;  %v1034_v35 = vld [vmem:[%s3238_s4 + $0x18] sm:$0xff] }
 0x7ae   :  { %2268 = vmatprep.mubr.msk.bf16.mxu0 %vm92_vm0, %v809_v26 }
 0x7af   :  { %2269 = vmatmul.mubr.msk.bf16.vlgmr.msra.gmra.mrb[24].mxu0 %vm92_vm0, %v810_v33  ;;  %v2937_v37 = vpack.c.bf16 %v1012_v36, %v1009_v30  ;;  %v2939_v27 = vpack.c.bf16 %v1004_v2, %v1001_v32  ;;  %v1032_v30 = vld [vmem:[%s3238_s4 + $0x8] sm:$0xff] }
 0x7b0   :  { %2272 = vmatprep.mubr.msk.bf16.mxu0 %vm92_vm0, %v811_v15  ;;  %v1031_v15 = vld [vmem:[%s3238_s4] sm:$0xff] }
 0x7b1   :  { %2424 = vmatprep.subr.msk.bf16.mxu0 %vm92_vm0, %v2939_v27  ;;  %v1060_v38 = vsel %vm92_vm0, %v2939_v27, 0  ;;  %v1063_v3 = vsel %vm92_vm0, %v2937_v37, 0 }
 0x7b2   :  { %2289 = vmatpush3.bf16.xpose.msra.mxu0 %v1060_v38 }
 0x7b3   :  { %2425 = vmatprep.subr.msk.bf16.mxu0 %vm92_vm0, %v2937_v37 }
 0x7b7   :  { %2273 = vmatmul.mubr.msk.bf16.gmra.mrb[28].mxu0 %vm92_vm0, %v812_v19 }
 0x7ba   :  { %2291 = vmatpush3.bf16.xpose.msra.mxu0 %v1063_v3 }
 0x7c2   :  { %v2286_v5 = vpop.f32.mrb[20].mxu1 }
 0x7c3   :  { %v1025_v24 = vadd.f32 %v2286_v5, %v2022_v20  ;;  %v1016_v40 = vpop.f32.mrb[21].mxu1 }
 0x7c4   :  { %v1017_v41 = vadd.f32 %v2022_v20, %v1016_v40  ;;  %v2287_v42 = vpop.f32.mrb[22].mxu1 }
 0x7c5   :  { %v1028_v6 = vadd.f32 %v2287_v42, %v2022_v20  ;;  %v1019_v43 = vpop.f32.mrb[23].mxu1  ;;  %v1037_v42 = vld [vmem:[%s3238_s4 + $0x30] sm:$0xff] }
 0x7c6   :  { %v1020_v44 = vadd.f32 %v2022_v20, %v1019_v43  ;;  %v1033_v20 = vld [vmem:[%s3238_s4 + $0x10] sm:$0xff]  ;;  %v1036_v43 = vld [vmem:[%s3238_s4 + $0x28] sm:$0xff] }
 0x7c7   :  { %v2949_v7 = vpack.c.bf16 %v1028_v6, %v1025_v24  ;;  %v1035_v24 = vld [vmem:[%s3238_s4 + $0x20] sm:$0xff] }
 0x7c8   :  { %v2951_v45 = vpack.c.bf16 %v1020_v44, %v1017_v41 }
 0x7c9   :  { %v1069_v11 = vsel %vm92_vm0, %v2949_v7, 0 }
 0x7ca   :  { %2426 = vmatprep.subr.msk.bf16.mxu0 %vm92_vm0, %v2951_v45  ;;  %v1066_v8 = vsel %vm92_vm0, %v2951_v45, 0 }
 0x7cb   :  { %2293 = vmatpush3.bf16.xpose.msra.mxu0 %v1066_v8 }
 0x7cc   :  { %2427 = vmatprep.subr.msk.bf16.mxu0 %vm92_vm0, %v2949_v7 }
 0x7d3   :  { %2295 = vmatpush3.bf16.xpose.msra.mxu0 %v1069_v11 }
 0x882   :  { %v2270_v46 = vpop.f32.mrb[24].mxu0 }
 0x883   :  { %v875_v48 = vpop.f32.mrb[25].mxu0  ;;  %v884_v50 = vadd.f32 %v2270_v46, %v2015_v47  ;;  %v1038_v46 = vld [vmem:[%s3238_s4 + $0x38] sm:$0xff] }
 0x884   :  { %v2271_v49 = vpop.f32.mrb[26].mxu0  ;;  %v876_v59 = vadd.f32 %v2015_v47, %v875_v48 }
 0x885   :  { %v887_v51 = vadd.f32 %v2271_v49, %v2015_v47  ;;  %v878_v12 = vpop.f32.mrb[27].mxu0 }
 0x886   :  { %v879_v60 = vadd.f32 %v2015_v47, %v878_v12 }
 0x887   :  { %v1040_v61 = vpack.c.bf16 %v887_v51, %v884_v50 }
 0x888   :  { %v1039_v62 = vpack.c.bf16 %v879_v60, %v876_v59 }
 0x88a   :  { %v2274_v63 = vpop.f32.mrb[28].mxu0  ;;  %2296 = vmatprep.mubr.msk.bf16.mxu0 %vm92_vm0, %v1039_v62 }
 0x88b   :  { %v891_v0 = vpop.f32.mrb[29].mxu0  ;;  %2297 = vmatmul.mubr.msk.bf16.vlgmr.msra.gmra.mrb[32].mxu0 %vm92_vm0, %v1040_v61  ;;  %v900_v4 = vadd.f32 %v2274_v63, %v2015_v47 }
 0x88c   :  { %v2275_v1 = vpop.f32.mrb[30].mxu0  ;;  %v892_v13 = vadd.f32 %v2015_v47, %v891_v0 }
 0x88d   :  { %v903_v9 = vadd.f32 %v2275_v1, %v2015_v47  ;;  %v894_v10 = vpop.f32.mrb[31].mxu0 }
 0x88e   :  { %v895_v14 = vadd.f32 %v2015_v47, %v894_v10 }
 0x88f   :  { %v1042_v26 = vpack.c.bf16 %v903_v9, %v900_v4 }
 0x890   :  { %v1041_v33 = vpack.c.bf16 %v895_v14, %v892_v13 }
 0x892   :  { %2300 = vmatprep.mubr.msk.bf16.mxu0 %vm92_vm0, %v1041_v33 }
 0x893   :  { %2301 = vmatmul.mubr.msk.bf16.gmra.mrb[36].mxu0 %vm92_vm0, %v1042_v26 }
 0x95e   :  { %v2298_v19 = vpop.f32.mrb[32].mxu0 }
 0x95f   :  { %v1105_v29 = vpop.f32.mrb[33].mxu0  ;;  %v1114_v28 = vadd.f32 %v2298_v19, %v1033_v20 }
 0x960   :  { %v1106_v31 = vadd.f32 %v1105_v29, %v1031_v15  ;;  %v2299_v32 = vpop.f32.mrb[34].mxu0 }
 0x961   :  { %v1108_v36 = vpop.f32.mrb[35].mxu0  ;;  %v1117_v3 = vadd.f32 %v2299_v32, %v1034_v35  ;;  %v1142_v41 = vsel %vm283_vm1, %v1114_v28, -inf }
 0x962   :  { %v1109_v2 = vadd.f32 %v1108_v36, %v1032_v30  ;;  %v1136_v38 = vsel %vm283_vm1, %v1106_v31, -inf }
 0x963   :  { %1137 = vmax.xlane.f32.xlu1 %v1136_v38  ;;  %v1145_v11 = vsel %vm283_vm1, %v1117_v3, -inf }
 0x964   :  { %v1139_v5 = vsel %vm283_vm1, %v1109_v2, -inf }
 0x965   :  { %1140 = vmax.xlane.f32.xlu0 %v1139_v5 }
 0x966   :  { %v2302_v40 = vpop.f32.mrb[36].mxu0 }
 0x967   :  { %v1121_v6 = vpop.f32.mrb[37].mxu0  ;;  %1143 = vmax.xlane.f32.xlu1 %v1142_v41  ;;  %v1130_v48 = vadd.f32 %v2302_v40, %v1037_v42 }
 0x968   :  { %v1122_v44 = vadd.f32 %v1121_v6, %v1035_v24  ;;  %v2303_v8 = vpop.f32.mrb[38].mxu0 }
 0x969   :  { %v1124_v47 = vpop.f32.mrb[39].mxu0  ;;  %1146 = vmax.xlane.f32.xlu0 %v1145_v11  ;;  %v1133_v51 = vadd.f32 %v2303_v8, %v1038_v46  ;;  %v1154_v59 = vsel %vm283_vm1, %v1130_v48, -inf }
 0x96a   :  { %v1125_v49 = vadd.f32 %v1124_v47, %v1036_v43  ;;  %v1148_v50 = vsel %vm283_vm1, %v1122_v44, -inf }
 0x96b   :  { %1149 = vmax.xlane.f32.xlu1 %v1148_v50  ;;  %v1157_v60 = vsel %vm283_vm1, %v1133_v51, -inf }
 0x96c   :  { %v1151_v12 = vsel %vm283_vm1, %v1125_v49, -inf }
 0x96d   :  { %1152 = vmax.xlane.f32.xlu0 %v1151_v12 }
 0x96f   :  { %1155 = vmax.xlane.f32.xlu1 %v1154_v59 }
 0x971   :  { %1158 = vmax.xlane.f32.xlu0 %v1157_v60 }
 0x980   :  { %1232 = vrot.lane.b32.xlu1 %v2939_v27, %s2520_s0 }
 0x9f0   :  { %v1138_v61 = vpop.xlane.xlu1 %1137 }
 0x9f1   :  { %v1160_v62 = vsub.f32 %v1106_v31, %v1138_v61 }
 0x9f2   :  { %v1141_v63 = vpop.xlane.xlu0 %1140 }
 0x9f3   :  { %v1161_v1 = vsub.f32 %v1109_v2, %v1141_v63  ;;  %v1168_v9 = vmul.f32 1.442695, %v1160_v62 }
 0x9f4   :  { %v1144_v0 = vpop.xlane.xlu1 %1143 }
 0x9f5   :  { %v1162_v4 = vsub.f32 %v1114_v28, %v1144_v0  ;;  %v1170_v33 = vmul.f32 1.442695, %v1161_v1 }
 0x9f6   :  { %v1147_v10 = vpop.xlane.xlu0 %1146 }
 0x9f7   :  { %v1172_v13 = vmul.f32 1.442695, %v1162_v4  ;;  %v1163_v14 = vsub.f32 %v1117_v3, %v1147_v10 }
 0x9f8   :  { %v1150_v26 = vpop.xlane.xlu1 %1149 }
 0x9f9   :  { %2484 = vpow2.f32 %v1172_v13  ;;  %v1174_v15 = vmul.f32 1.442695, %v1163_v14  ;;  %v1164_v19 = vsub.f32 %v1122_v44, %v1150_v26 }
 0x9fa   :  { %2486 = vpow2.f32 %v1168_v9  ;;  %v1153_v20 = vpop.xlane.xlu0 %1152 }
 0x9fb   :  { %2488 = vpow2.f32 %v1174_v15  ;;  %v1165_v27 = vsub.f32 %v1125_v49, %v1153_v20  ;;  %v1176_v31 = vmul.f32 1.442695, %v1164_v19 }
 0x9fc   :  { %v1156_v29 = vpop.xlane.xlu1 %1155  ;;  %2490 = vpow2.f32 %v1170_v33 }
 0x9fd   :  { %v1166_v30 = vsub.f32 %v1130_v48, %v1156_v29  ;;  %v1178_v2 = vmul.f32 1.442695, %v1165_v27 }
 0x9fe   :  { %v1159_v32 = vpop.xlane.xlu0 %1158 }
 0x9ff   :  { %v1180_v35 = vmul.f32 1.442695, %v1166_v30  ;;  %v1167_v36 = vsub.f32 %v1133_v51, %v1159_v32 }
 0xa00   :  { %v1233_v28 = vpop.permute.xlu1 %1232 }
 0xa01   :  { %2492 = vpow2.f32 %v1180_v35  ;;  %v1182_v38 = vmul.f32 1.442695, %v1167_v36  ;;  %2304 = vmatprep.subr.bf16.mxu1 %v1233_v28 }
 0xa02   :  { %2494 = vpow2.f32 %v1176_v31  ;;  %2305 = vmatpush3.bf16.msra.mxu1 %v1233_v28 }
 0xa03   :  { %v3002_v3 = vpop.eup %2484  ;;  %2496 = vpow2.f32 %v1182_v38  ;;  %v2442_v38 = vld [vmem:[%s3239_s10] sm:$0xff]  }
 0xa04   :  { %v2487_v5 = vpop.eup %2486  ;;  %v1190_v24 = vsel %vm283_vm1, %v3002_v3, 0.0  ;;  %2498 = vpow2.f32 %v1178_v2  ;;  %2348 = vmatprep.subr.bf16.mxu0 %v2442_v38 }
 0xa05   :  { %v2489_v40 = vpop.eup %2488  ;;  %1191 = vadd.xlane.f32.xlu1 %v1190_v24  ;;  %v1184_v6 = vsel %vm283_vm1, %v2487_v5, 0.0  ;;  %2349 = vmatpush3.bf16.msra.mxu0 %v2442_v38 }
 0xa06   :  { %v1193_v41 = vsel %vm283_vm1, %v2489_v40, 0.0  ;;  %v2491_v42 = vpop.eup %2490 }
 0xa07   :  { %1194 = vadd.xlane.f32.xlu0 %v1193_v41  ;;  %v1187_v43 = vsel %vm283_vm1, %v2491_v42, 0.0 }
 0xa09   :  { %1185 = vadd.xlane.f32.xlu1 %v1184_v6 }
 0xa0b   :  { %v2493_v44 = vpop.eup %2492  ;;  %1188 = vadd.xlane.f32.xlu0 %v1187_v43 }
 0xa0c   :  { %v2495_v8 = vpop.eup %2494  ;;  %v1202_v11 = vsel %vm283_vm1, %v2493_v44, 0.0 }
 0xa0d   :  { %v2497_v46 = vpop.eup %2496  ;;  %1203 = vadd.xlane.f32.xlu1 %v1202_v11  ;;  %v1196_v49 = vsel %vm283_vm1, %v2495_v8, 0.0 }
 0xa0e   :  { %v1205_v47 = vsel %vm283_vm1, %v2497_v46, 0.0  ;;  %v2499_v48 = vpop.eup %2498 }
 0xa0f   :  { %1206 = vadd.xlane.f32.xlu0 %v1205_v47  ;;  %v1199_v50 = vsel %vm283_vm1, %v2499_v48, 0.0 }
 0xa11   :  { %1197 = vadd.xlane.f32.xlu1 %v1196_v49 }
 0xa13   :  { %1200 = vadd.xlane.f32.xlu0 %v1199_v50 }
 0xa22   :  { %1236 = vrot.lane.b32.xlu1 %v2951_v45, %s2520_s0 }
 0xa26   :  { %1238 = vrot.lane.b32.xlu1 %v2949_v7, %s2520_s0 }
 0xa29   :  { %1234 = vrot.lane.b32.xlu0 %v2937_v37, %s2520_s0 }
 0xa92   :  { %v1192_v51 = vpop.xlane.xlu1 %1191 }
 0xa94   :  { %v1195_v12 = vpop.xlane.xlu0 %1194 }
 0xa96   :  { %v1186_v59 = vpop.xlane.xlu1 %1185 }
 0xa97   :  { %2500 = vrcp.f32 %v1186_v59 }
 0xa98   :  { %v1189_v60 = vpop.xlane.xlu0 %1188 }
 0xa99   :  { %2502 = vrcp.f32 %v1189_v60 }
 0xa9a   :  { %v1204_v61 = vpop.xlane.xlu1 %1203  ;;  %2504 = vrcp.f32 %v1195_v12  ;;  %v2049_v12 = vld [vmem:[%s3231_s5 + $0x4] ss:$0 sm:$0xff] }
 0xa9b   :  { %2506 = vrcp.f32 %v1192_v51 }
 0xa9c   :  { %v1207_v62 = vpop.xlane.xlu0 %1206 }
 0xa9e   :  { %v1198_v63 = vpop.xlane.xlu1 %1197 }
 0xa9f   :  { %2508 = vrcp.f32 %v1198_v63 }
 0xaa0   :  { %v1201_v0 = vpop.xlane.xlu0 %1200 }
 0xaa1   :  { %v2501_v45 = vpop.eup %2500  ;;  %2510 = vrcp.f32 %v1201_v0 }
 0xaa2   :  { %v1237_v7 = vpop.permute.xlu1 %1236  ;;  %v1216_v9 = vmul.f32 %v2501_v45, %v2487_v5  ;;  %2512 = vrcp.f32 %v1207_v62 }
 0xaa3   :  { %v2503_v1 = vpop.eup %2502  ;;  %2514 = vrcp.f32 %v1204_v61 }
 0xaa4   :  { %v1235_v4 = vpop.permute.xlu0 %1234  ;;  %v1217_v37 = vmul.f32 %v2503_v1, %v2491_v42  ;;  %v2505_v13 = vpop.eup %2504 }
 0xaa5   :  { %2306 = vmatprep.subr.bf16.mxu1 %v1235_v4  ;;  %v2507_v14 = vpop.eup %2506  ;;  %v1219_v19 = vmul.f32 %v2505_v13, %v2489_v40 }
 0xaa6   :  { %2307 = vmatpush3.bf16.msra.mxu1 %v1235_v4  ;;  %v1224_v10 = vpack.c.bf16 %v1217_v37, %v1216_v9  ;;  %v1239_v33 = vpop.permute.xlu1 %1238  ;;  %v1218_v29 = vmul.f32 %v2507_v14, %v3002_v3 }
 0xaa7   :  { %2308 = vmatprep.subr.bf16.mxu1 %v1237_v7 }
 0xaa8   :  { %2312 = vmatprep.mubr.msk.bf16.mxu1 %vm283_vm1, %v1224_v10  ;;  %v1225_v30 = vpack.c.bf16 %v1219_v19, %v1218_v29 }
 0xaa9   :  { %v2509_v26 = vpop.eup %2508 }
 0xaaa   :  { %2309 = vmatpush3.bf16.msra.mxu1 %v1237_v7  ;;  %v1220_v27 = vmul.f32 %v2509_v26, %v2495_v8 }
 0xaab   :  { %v2511_v15 = vpop.eup %2510  ;;  %2310 = vmatprep.subr.bf16.mxu1 %v1239_v33 }
 0xaac   :  { %v1221_v20 = vmul.f32 %v2511_v15, %v2499_v48  ;;  %v2513_v31 = vpop.eup %2512 }
 0xaad   :  { %v2515_v35 = vpop.eup %2514  ;;  %v1223_v36 = vmul.f32 %v2513_v31, %v2497_v46 }
 0xaae   :  { %2311 = vmatpush3.bf16.msra.mxu1 %v1239_v33  ;;  %v1226_v32 = vpack.c.bf16 %v1221_v20, %v1220_v27  ;;  %v1222_v28 = vmul.f32 %v2515_v35, %v2493_v44 }
 0xab0   :  { %v1227_v2 = vpack.c.bf16 %v1223_v36, %v1222_v28 }
 0xab1   :  { %2313 = vmatmul.mubr.msk.bf16.vlgmr.msra.gmra.mrb[24].mxu1 %vm283_vm1, %v1225_v30 }
 0xab2   :  { %2316 = vmatprep.mubr.msk.bf16.mxu1 %vm283_vm1, %v1226_v32 }
 0xab9   :  { %2317 = vmatmul.mubr.msk.bf16.gmra.mrb[28].mxu1 %vm283_vm1, %v1227_v2 }
 0xaba   :  { %2336 = vmatprep.mubr.msk.f32.mxu1 %vm283_vm1, %v2748_v39 }
 0xb84   :  { %v2314_v3 = vpop.f32.mrb[24].mxu1 }
 0xb85   :  { %v1290_v5 = vpop.f32.mrb[25].mxu1 }
 0xb86   :  { %v2315_v24 = vpop.f32.mrb[26].mxu1 }
 0xb87   :  { %v2408_v40 = vpack.c.bf16 %v2315_v24, %v2314_v3  ;;  %v1293_v41 = vpop.f32.mrb[27].mxu1 }
 0xb88   :  { %v2404_v42 = vpack.c.bf16 %v1293_v41, %v1290_v5 }
 0xb8a   :  { %2405 = vmatprep.subr.bf16.mxu1 %v2404_v42 }
 0xb8b   :  { %2407 = vmatpush3.bf16.msra.mxu1 %v2404_v42 }
 0xb8c   :  { %v2318_v6 = vpop.f32.mrb[28].mxu1  ;;  %2409 = vmatprep.subr.bf16.mxu1 %v2408_v40 }
 0xb8d   :  { %v1306_v43 = vpop.f32.mrb[29].mxu1 }
 0xb8e   :  { %v2319_v44 = vpop.f32.mrb[30].mxu1 }
 0xb8f   :  { %v2416_v8 = vpack.c.bf16 %v2319_v44, %v2318_v6  ;;  %v1309_v39 = vpop.f32.mrb[31].mxu1  ;;  %2411 = vmatpush3.bf16.msra.mxu1 %v2408_v40 }
 0xb90   :  { %v2412_v11 = vpack.c.bf16 %v1309_v39, %v1306_v43 }
 0xb92   :  { %2413 = vmatprep.subr.bf16.mxu1 %v2412_v11 }
 0xb93   :  { %2415 = vmatpush3.bf16.msra.mxu1 %v2412_v11 }
 0xb94   :  { %2417 = vmatprep.subr.bf16.mxu1 %v2416_v8 }
 0xb97   :  { %2419 = vmatpush3.bf16.msra.mxu1 %v2416_v8 }
 0xb9a   :  { %2337 = vmatmul.mubr.msk.f32.vlgmr.msra.gmra.mrb[32].mxu1 %vm283_vm1, %v2758_v52  ;;  %v2443_v52 = vld [vmem:[%s3239_s10 + $0x8] sm:$0xff]  }
 0xb9b   :  { %2339 = vmatprep.mubr.msk.f32.mxu1 %vm283_vm1, %v2763_v53  ;;  %2350 = vmatprep.subr.bf16.mxu0 %v2443_v52 }
 0xb9c   :  { %2351 = vmatpush3.bf16.msra.mxu0 %v2443_v52 }
 0xb9e   :  { %2340 = vmatmul.mubr.msk.f32.gmra.mrb[34].mxu1 %vm283_vm1, %v2772_v54 }
 0xb9f   :  { %2342 = vmatprep.mubr.msk.f32.mxu1 %vm283_vm1, %v2777_v55 }
 0xba2   :  { %2343 = vmatmul.mubr.msk.f32.gmra.mrb[36].mxu1 %vm283_vm1, %v2786_v56 }
 0xba3   :  { %2345 = vmatprep.mubr.msk.f32.mxu1 %vm283_vm1, %v2791_v57 }
 0xba6   :  { %2346 = vmatmul.mubr.msk.f32.gmra.mrb[38].mxu1 %vm283_vm1, %v2800_v58 }
 0xc6d   :  { %v2338_v53 = vpop.f32.mrb[32].mxu1 }
 0xc6e   :  { %v1387_v54 = vpop.f32.mrb[33].mxu1 }
 0xc6f   :  { %v1430_v46 = vpack.c.bf16 %v2338_v53, %v1387_v54 }
 0xc71   :  { %v2341_v47 = vpop.f32.mrb[34].mxu1  ;;  %2352 = vmatprep.mubr.msk.bf16.mxu0 %vm92_vm0, %v1430_v46 }
 0xc72   :  { %v1397_v55 = vpop.f32.mrb[35].mxu1 }
 0xc73   :  { %v1431_v56 = vpack.c.bf16 %v2341_v47, %v1397_v55 }
 0xc75   :  { %2353 = vmatmul.mubr.msk.bf16.vlgmr.msra.gmra.mrb[40].mxu0 %vm92_vm0, %v1431_v56  ;;  %v2344_v57 = vpop.f32.mrb[36].mxu1 }
 0xc76   :  { %v1407_v48 = vpop.f32.mrb[37].mxu1 }
 0xc77   :  { %v1432_v49 = vpack.c.bf16 %v2344_v57, %v1407_v48 }
 0xc79   :  { %v2347_v58 = vpop.f32.mrb[38].mxu1  ;;  %2356 = vmatprep.mubr.msk.bf16.mxu0 %vm92_vm0, %v1432_v49 }
 0xc7a   :  { %v1417_v50 = vpop.f32.mrb[39].mxu1 }
 0xc7b   :  { %v1433_v51 = vpack.c.bf16 %v2347_v58, %v1417_v50 }
 0xc7d   :  { %2357 = vmatmul.mubr.msk.bf16.gmra.mrb[44].mxu0 %vm92_vm0, %v1433_v51 }
 0xd48   :  { %v2354_v59 = vpop.f32.mrb[40].mxu0 }
 0xd49   :  { %v1496_v60 = vpop.f32.mrb[41].mxu0  ;;  %v1505_v61 = vadd.f32 %v2354_v59, %v2049_v12 }
 0xd4a   :  { %v1497_v62 = vadd.f32 %v2049_v12, %v1496_v60  ;;  %v2355_v63 = vpop.f32.mrb[42].mxu0 }
 0xd4b   :  { %v1499_v0 = vpop.f32.mrb[43].mxu0  ;;  %v1508_v7 = vadd.f32 %v2355_v63, %v2049_v12  ;;  %v1529_v37 = vadd.f32 %v1505_v61, %v2905_v18 }
 0xd4c   :  { %v1500_v45 = vadd.f32 %v2049_v12, %v1499_v0  ;;  %v1527_v1 = vadd.f32 %v1497_v62, %v2899_v34 }
 0xd4d   :  { %v1530_v26 = vadd.f32 %v1508_v7, %v2908_v22  ;;  %v1541_v34 = vsel %vm92_vm0, %v1529_v37, 0.0 }
 0xd4e   :  { %v1535_v4 = vsel %vm92_vm0, %v1527_v1, 0.0  ;;  %v1528_v9 = vadd.f32 %v1500_v45, %v2902_v23 }
 0xd4f   :  { %1536 = vadd.xlane.f32.xlu0 %v1535_v4  ;;  %v1544_v18 = vsel %vm92_vm0, %v1530_v26, 0.0 }
 0xd50   :  { %v2358_v10 = vpop.f32.mrb[44].mxu0  ;;  %v1538_v13 = vsel %vm92_vm0, %v1528_v9, 0.0 }
 0xd51   :  { %1539 = vadd.xlane.f32.xlu1 %v1538_v13  ;;  %v1512_v14 = vpop.f32.mrb[45].mxu0  ;;  %v1521_v33 = vadd.f32 %v2358_v10, %v2049_v12 }
 0xd52   :  { %v1513_v15 = vadd.f32 %v2049_v12, %v1512_v14  ;;  %v2359_v19 = vpop.f32.mrb[46].mxu0  ;;  %v2444_v14 = vld [vmem:[%s3240_s11] sm:$0xff]  }
 0xd53   :  { %1542 = vadd.xlane.f32.xlu0 %v1541_v34  ;;  %v1515_v20 = vpop.f32.mrb[47].mxu0  ;;  %v1524_v27 = vadd.f32 %v2359_v19, %v2049_v12  ;;  %v1533_v32 = vadd.f32 %v1521_v33, %v2926_v16  ;;  %2360 = vmatprep.subr.bf16.mxu1 %v2444_v14  ;;  %v2446_v33 = vld [vmem:[%s3241_s12] sm:$0xff]  }
 0xd54   :  { %v1516_v29 = vadd.f32 %v2049_v12, %v1515_v20  ;;  %v1531_v23 = vadd.f32 %v1513_v15, %v2911_v25  ;;  %2361 = vmatpush3.bf16.msra.mxu1 %v2444_v14  ;;  %v2447_v15 = vld [vmem:[%s3241_s12 + $0x8] sm:$0xff]   ;;  %2372 = vmatprep.subr.bf16.mxu0 %v2446_v33 }
 0xd55   :  { %v1553_v35 = vsel %vm92_vm0, %v1533_v32, 0.0  ;;  %v1534_v36 = vadd.f32 %v1524_v27, %v2929_v17  ;;  %2373 = vmatpush3.bf16.msra.mxu0 %v2446_v33 }
 0xd56   :  { %v1547_v30 = vsel %vm92_vm0, %v1531_v23, 0.0  ;;  %v1532_v31 = vadd.f32 %v1516_v29, %v2914_v21  ;;  %2374 = vmatprep.subr.bf16.mxu0 %v2447_v15 }
 0xd57   :  { %1545 = vadd.xlane.f32.xlu0 %v1544_v18  ;;  %1548 = vadd.xlane.f32.xlu1 %v1547_v30  ;;  %v1556_v25 = vsel %vm92_vm0, %v1534_v36, 0.0 }
 0xd58   :  { %v1550_v22 = vsel %vm92_vm0, %v1532_v31, 0.0 }
 0xd59   :  { %2375 = vmatpush3.bf16.msra.mxu0 %v2447_v15 }
 0xd5b   :  { %1551 = vadd.xlane.f32.xlu0 %v1550_v22  ;;  %1554 = vadd.xlane.f32.xlu1 %v1553_v35 }
 0xd5f   :  { %1557 = vadd.xlane.f32.xlu0 %v1556_v25 }
 0xddc   :  { %v1537_v28 = vpop.xlane.xlu0 %1536 }
 0xdde   :  { %v1540_v2 = vpop.xlane.xlu1 %1539 }
 0xddf   :  { %v1559_v38 = vadd.f32 %v1540_v2, %v1537_v28 }
 0xde0   :  { %v1543_v3 = vpop.xlane.xlu0 %1542 }
 0xde1   :  { %v1560_v21 = vadd.f32 %v1559_v38, %v1543_v3 }
 0xde4   :  { %v1546_v5 = vpop.xlane.xlu0 %1545  ;;  %v1549_v16 = vpop.xlane.xlu1 %1548 }
 0xde5   :  { %v1561_v24 = vadd.f32 %v1560_v21, %v1546_v5 }
 0xde7   :  { %v1562_v40 = vadd.f32 %v1561_v24, %v1549_v16 }
 0xde8   :  { %v1552_v41 = vpop.xlane.xlu0 %1551  ;;  %v1555_v6 = vpop.xlane.xlu1 %1554 }
 0xde9   :  { %v1563_v42 = vadd.f32 %v1562_v40, %v1552_v41 }
 0xdeb   :  { %v1564_v43 = vadd.f32 %v1563_v42, %v1555_v6 }
 0xdec   :  { %v1558_v44 = vpop.xlane.xlu0 %1557 }
 0xded   :  { %v1565_v17 = vadd.f32 %v1564_v43, %v1558_v44 }
 0xdef   :  { %v1566_v8 = vrot.slane %v1565_v17, 4 }
 0xdf1   :  { %v1567_v39 = vadd.f32 %v1566_v8, %v1565_v17 }
 0xdf3   :  { %v1568_v11 = vrot.slane %v1567_v39, 2 }
 0xdf5   :  { %v1569_v52 = vadd.f32 %v1568_v11, %v1567_v39 }
 0xdf7   :  { %v1570_v53 = vrot.slane %v1569_v52, 1 }
 0xdf9   :  { %v1571_v54 = vadd.f32 %v1570_v53, %v1569_v52 }
 0xdfb   :  { %v1572_v46 = vmul.f32 0.00048828125, %v1571_v54 }
 0xdfd   :  { %v3069_v47 = vsub.f32 %v1528_v9, %v1572_v46  ;;  %v3071_v55 = vsub.f32 %v1527_v1, %v1572_v46  ;;  %v3073_v56 = vsub.f32 %v1530_v26, %v1572_v46  ;;  %v3075_v57 = vsub.f32 %v1529_v37, %v1572_v46  ;;  %v2445_v26 = vld [vmem:[%s3240_s11 + $0x8] sm:$0xff]  }
 0xdfe   :  { %v3081_v58 = vsub.f32 %v1532_v31, %v1572_v46  ;;  %v3083_v50 = vsub.f32 %v1531_v23, %v1572_v46  ;;  %v3091_v61 = vsub.f32 %v1534_v36, %v1572_v46  ;;  %v3093_v62 = vsub.f32 %v1533_v32, %v1572_v46  ;;  %2362 = vmatprep.subr.bf16.mxu1 %v2445_v26 }
 0xdff   :  { %v1582_v48 = vmul.f32 %v3069_v47, %v3069_v47  ;;  %v1581_v49 = vmul.f32 %v3071_v55, %v3071_v55  ;;  %v1584_v59 = vmul.f32 %v3073_v56, %v3073_v56  ;;  %v1583_v60 = vmul.f32 %v3075_v57, %v3075_v57  ;;  %2363 = vmatpush3.bf16.msra.mxu1 %v2445_v26 }
 0xe00   :  { %v1586_v45 = vmul.f32 %v3081_v58, %v3081_v58  ;;  %v1585_v1 = vmul.f32 %v3083_v50, %v3083_v50  ;;  %v1588_v9 = vmul.f32 %v3091_v61, %v3091_v61  ;;  %v1587_v37 = vmul.f32 %v3093_v62, %v3093_v62 }
 0xe01   :  { %v1592_v51 = vsel %vm92_vm0, %v1582_v48, 0.0  ;;  %v1589_v12 = vsel %vm92_vm0, %v1581_v49, 0.0  ;;  %v1598_v63 = vsel %vm92_vm0, %v1584_v59, 0.0  ;;  %v1595_v0 = vsel %vm92_vm0, %v1583_v60, 0.0 }
 0xe02   :  { %1593 = vadd.xlane.f32.xlu0 %v1592_v51  ;;  %1590 = vadd.xlane.f32.xlu1 %v1589_v12  ;;  %v1604_v7 = vsel %vm92_vm0, %v1586_v45, 0.0  ;;  %v1601_v4 = vsel %vm92_vm0, %v1585_v1, 0.0  ;;  %v1610_v10 = vsel %vm92_vm0, %v1588_v9, 0.0  ;;  %v1607_v13 = vsel %vm92_vm0, %v1587_v37, 0.0 }
 0xe06   :  { %1599 = vadd.xlane.f32.xlu0 %v1598_v63  ;;  %1596 = vadd.xlane.f32.xlu1 %v1595_v0 }
 0xe0a   :  { %1605 = vadd.xlane.f32.xlu0 %v1604_v7  ;;  %1602 = vadd.xlane.f32.xlu1 %v1601_v4 }
 0xe0e   :  { %1611 = vadd.xlane.f32.xlu0 %v1610_v10  ;;  %1608 = vadd.xlane.f32.xlu1 %v1607_v13 }
 0xe8f   :  { %v1594_v19 = vpop.xlane.xlu0 %1593  ;;  %v1591_v34 = vpop.xlane.xlu1 %1590 }
 0xe90   :  { %v1613_v20 = vadd.f32 %v1594_v19, %v1591_v34 }
 0xe93   :  { %v1600_v29 = vpop.xlane.xlu0 %1599  ;;  %v1597_v23 = vpop.xlane.xlu1 %1596 }
 0xe94   :  { %v1614_v18 = vadd.f32 %v1613_v20, %v1597_v23 }
 0xe96   :  { %v1615_v27 = vadd.f32 %v1614_v18, %v1600_v29  ;;  %v2063_v29 = vld [vmem:[%s3231_s5 + $0x6] ss:$0 sm:$0xff] }
 0xe97   :  { %v1606_v30 = vpop.xlane.xlu0 %1605  ;;  %v1603_v31 = vpop.xlane.xlu1 %1602 }
 0xe98   :  { %v1616_v32 = vadd.f32 %v1615_v27, %v1603_v31 }
 0xe9a   :  { %v1617_v22 = vadd.f32 %v1616_v32, %v1606_v30 }
 0xe9b   :  { %v1609_v35 = vpop.xlane.xlu1 %1608  ;;  %v1612_v25 = vpop.xlane.xlu0 %1611 }
 0xe9c   :  { %v1618_v36 = vadd.f32 %v1617_v22, %v1609_v35 }
 0xe9e   :  { %v1619_v28 = vadd.f32 %v1618_v36, %v1612_v25 }
 0xea0   :  { %v1620_v2 = vrot.slane %v1619_v28, 4 }
 0xea2   :  { %v1621_v38 = vadd.f32 %v1620_v2, %v1619_v28 }
 0xea4   :  { %v1622_v3 = vrot.slane %v1621_v38, 2 }
 0xea6   :  { %v1623_v21 = vadd.f32 %v1622_v3, %v1621_v38 }
 0xea8   :  { %v1624_v5 = vrot.slane %v1623_v21, 1 }
 0xeaa   :  { %v1625_v16 = vadd.f32 %v1624_v5, %v1623_v21 }
 0xeac   :  { %v1626_v24 = vmul.f32 0.00048828125, %v1625_v16 }
 0xeae   :  { %v1627_v40 = vadd.f32 1e-05, %v1626_v24 }
 0xeb0   :  { %2516 = vrsqrt.f32 %v1627_v40 }
 0xeba   :  { %v2517_v41 = vpop.eup %2516 }
 0xebb   :  { %v3122_v42 = vmul.f32 %v2517_v41, %v3071_v55  ;;  %v3125_v6 = vmul.f32 %v2517_v41, %v3069_v47  ;;  %v3128_v43 = vmul.f32 %v2517_v41, %v3075_v57  ;;  %v3131_v44 = vmul.f32 %v2517_v41, %v3073_v56  ;;  %v2448_v47 = vld [vmem:[%s3241_s12 + $0x10] sm:$0xff]   ;;  %v2449_v55 = vld [vmem:[%s3241_s12 + $0x18] sm:$0xff]   ;;  %v2056_v56 = vld [vmem:[%s3231_s5 + $0x5] ss:$0 sm:$0xff] }
 0xebc   :  { %v3134_v17 = vmul.f32 %v2517_v41, %v3083_v50  ;;  %v3137_v8 = vmul.f32 %v2517_v41, %v3081_v58  ;;  %v3149_v53 = vmul.f32 %v2517_v41, %v3093_v62  ;;  %v3152_v54 = vmul.f32 %v2517_v41, %v3091_v61  ;;  %2376 = vmatprep.subr.bf16.mxu0 %v2448_v47 }
 0xebd   :  { %v1641_v39 = vpack.c.bf16 %v3125_v6, %v3122_v42  ;;  %v1642_v11 = vpack.c.bf16 %v3131_v44, %v3128_v43  ;;  %2377 = vmatpush3.bf16.msra.mxu0 %v2448_v47 }
 0xebe   :  { %v1643_v52 = vpack.c.bf16 %v3137_v8, %v3134_v17  ;;  %v1644_v46 = vpack.c.bf16 %v3152_v54, %v3149_v53  ;;  %2378 = vmatprep.subr.bf16.mxu0 %v2449_v55 }
 0xebf   :  { %2364 = vmatprep.mubr.msk.bf16.mxu1 %vm92_vm0, %v1641_v39 }
 0xec0   :  { %2365 = vmatmul.mubr.msk.bf16.vlgmr.msra.gmra.mrb[40].mxu1 %vm92_vm0, %v1642_v11 }
 0xec1   :  { %2368 = vmatprep.mubr.msk.bf16.mxu1 %vm92_vm0, %v1643_v52  ;;  %2379 = vmatpush3.bf16.msra.mxu0 %v2449_v55 }
 0xec8   :  { %2369 = vmatmul.mubr.msk.bf16.gmra.mrb[44].mxu1 %vm92_vm0, %v1644_v46 }
 0xf93   :  { %v2366_v57 = vpop.f32.mrb[40].mxu1 }
 0xf94   :  { %v1716_v48 = vadd.f32 %v2366_v57, %v2056_v56  ;;  %v1707_v49 = vpop.f32.mrb[41].mxu1 }
 0xf95   :  { %v1708_v58 = vadd.f32 %v2056_v56, %v1707_v49  ;;  %v2367_v50 = vpop.f32.mrb[42].mxu1 }
 0xf96   :  { %v1719_v51 = vadd.f32 %v2367_v50, %v2056_v56  ;;  %v1710_v12 = vpop.f32.mrb[43].mxu1  ;;  %v1740_v60 = vmax.f32 %v1716_v48, 0.0 }
 0xf97   :  { %v1711_v59 = vadd.f32 %v2056_v56, %v1710_v12  ;;  %v1738_v62 = vmax.f32 %v1708_v58, 0.0 }
 0xf98   :  { %v1741_v61 = vmax.f32 %v1719_v51, 0.0 }
 0xf99   :  { %v1739_v63 = vmax.f32 %v1711_v59, 0.0 }
 0xf9a   :  { %v1755_v0 = vpack.c.bf16 %v1741_v61, %v1740_v60 }
 0xf9b   :  { %v1754_v45 = vpack.c.bf16 %v1739_v63, %v1738_v62  ;;  %v2370_v1 = vpop.f32.mrb[44].mxu1 }
 0xf9c   :  { %v1732_v7 = vadd.f32 %v2370_v1, %v2056_v56  ;;  %v1723_v4 = vpop.f32.mrb[45].mxu1 }
 0xf9d   :  { %v1724_v9 = vadd.f32 %v2056_v56, %v1723_v4  ;;  %v2371_v37 = vpop.f32.mrb[46].mxu1  ;;  %2380 = vmatprep.mubr.msk.bf16.mxu0 %vm283_vm1, %v1754_v45 }
 0xf9e   :  { %v1735_v10 = vadd.f32 %v2371_v37, %v2056_v56  ;;  %v1726_v13 = vpop.f32.mrb[47].mxu1  ;;  %2381 = vmatmul.mubr.msk.bf16.vlgmr.msra.gmra.mrb[48].mxu0 %vm283_vm1, %v1755_v0  ;;  %v1744_v26 = vmax.f32 %v1732_v7, 0.0 }
 0xf9f   :  { %v1727_v14 = vadd.f32 %v2056_v56, %v1726_v13  ;;  %v1742_v15 = vmax.f32 %v1724_v9, 0.0 }
 0xfa0   :  { %v1745_v33 = vmax.f32 %v1735_v10, 0.0 }
 0xfa1   :  { %v1743_v19 = vmax.f32 %v1727_v14, 0.0 }
 0xfa2   :  { %v1757_v34 = vpack.c.bf16 %v1745_v33, %v1744_v26 }
 0xfa3   :  { %v1756_v20 = vpack.c.bf16 %v1743_v19, %v1742_v15 }
 0xfa5   :  { %2384 = vmatprep.mubr.msk.bf16.mxu0 %vm283_vm1, %v1756_v20 }
 0xfa6   :  { %2385 = vmatmul.mubr.msk.bf16.gmra.mrb[52].mxu0 %vm283_vm1, %v1757_v34 }
0x1071   :  { %v2382_v23 = vpop.f32.mrb[48].mxu0 }
0x1072   :  { %v1832_v18 = vpop.f32.mrb[49].mxu0  ;;  %v1841_v27 = vadd.f32 %v2382_v23, %v2063_v29 }
0x1073   :  { %v1833_v30 = vadd.f32 %v2063_v29, %v1832_v18  ;;  %v2383_v31 = vpop.f32.mrb[50].mxu0 }
0x1074   :  { %v1835_v32 = vpop.f32.mrb[51].mxu0  ;;  %v1844_v22 = vadd.f32 %v2383_v31, %v2063_v29  ;;  %v1865_v2 = vadd.f32 %v1841_v27, %v3128_v43 }
0x1075   :  { %v1836_v35 = vadd.f32 %v2063_v29, %v1835_v32  ;;  %v1863_v36 = vadd.f32 %v1833_v30, %v3122_v42 }
0x1076   :  { %v1866_v21 = vadd.f32 %v1844_v22, %v3131_v44  ;;  %v1877_v41 = vsel %vm92_vm0, %v1865_v2, 0.0 }
0x1077   :  { %v1871_v25 = vsel %vm92_vm0, %v1863_v36, 0.0  ;;  %v1864_v28 = vadd.f32 %v1836_v35, %v3125_v6 }
0x1078   :  { %1872 = vadd.xlane.f32.xlu1 %v1871_v25  ;;  %v1880_v6 = vsel %vm92_vm0, %v1866_v21, 0.0 }
0x1079   :  { %v2386_v38 = vpop.f32.mrb[52].mxu0  ;;  %v1874_v3 = vsel %vm92_vm0, %v1864_v28, 0.0 }
0x107a   :  { %v1848_v5 = vpop.f32.mrb[53].mxu0  ;;  %1875 = vadd.xlane.f32.xlu0 %v1874_v3  ;;  %v1857_v16 = vadd.f32 %v2386_v38, %v2063_v29 }
0x107b   :  { %v1849_v24 = vadd.f32 %v2063_v29, %v1848_v5  ;;  %v2387_v40 = vpop.f32.mrb[54].mxu0 }
0x107c   :  { %v1851_v42 = vpop.f32.mrb[55].mxu0  ;;  %1878 = vadd.xlane.f32.xlu1 %v1877_v41  ;;  %v1860_v39 = vadd.f32 %v2387_v40, %v2063_v29  ;;  %v1869_v46 = vadd.f32 %v1857_v16, %v3149_v53 }
0x107d   :  { %v1852_v11 = vadd.f32 %v2063_v29, %v1851_v42  ;;  %v1867_v43 = vadd.f32 %v1849_v24, %v3134_v17 }
0x107e   :  { %1881 = vadd.xlane.f32.xlu0 %v1880_v6  ;;  %v1870_v55 = vadd.f32 %v1860_v39, %v3152_v54  ;;  %v1889_v56 = vsel %vm92_vm0, %v1869_v46, 0.0 }
0x107f   :  { %v1883_v52 = vsel %vm92_vm0, %v1867_v43, 0.0  ;;  %v1868_v44 = vadd.f32 %v1852_v11, %v3137_v8 }
0x1080   :  { %1884 = vadd.xlane.f32.xlu1 %v1883_v52  ;;  %v1892_v57 = vsel %vm92_vm0, %v1870_v55, 0.0 }
0x1081   :  { %v1886_v47 = vsel %vm92_vm0, %v1868_v44, 0.0 }
0x1082   :  { %1887 = vadd.xlane.f32.xlu0 %v1886_v47 }
0x1084   :  { %1890 = vadd.xlane.f32.xlu1 %v1889_v56 }
0x1086   :  { %1893 = vadd.xlane.f32.xlu0 %v1892_v57 }
0x1105   :  { %v1873_v17 = vpop.xlane.xlu1 %1872 }
0x1107   :  { %v1876_v48 = vpop.xlane.xlu0 %1875 }
0x1108   :  { %v1895_v49 = vadd.f32 %v1876_v48, %v1873_v17 }
0x1109   :  { %v1879_v58 = vpop.xlane.xlu1 %1878 }
0x110a   :  { %v1896_v50 = vadd.f32 %v1895_v49, %v1879_v58 }
0x110b   :  { %v1882_v8 = vpop.xlane.xlu0 %1881 }
0x110c   :  { %v1897_v51 = vadd.f32 %v1896_v50, %v1882_v8 }
0x110d   :  { %v1885_v53 = vpop.xlane.xlu1 %1884 }
0x110e   :  { %v1898_v12 = vadd.f32 %v1897_v51, %v1885_v53 }
0x110f   :  { %v1888_v59 = vpop.xlane.xlu0 %1887 }
0x1110   :  { %v1899_v60 = vadd.f32 %v1898_v12, %v1888_v59 }
0x1111   :  { %v1891_v61 = vpop.xlane.xlu1 %1890 }
0x1112   :  { %v1900_v54 = vadd.f32 %v1899_v60, %v1891_v61 }
0x1113   :  { %v1894_v62 = vpop.xlane.xlu0 %1893 }
0x1114   :  { %v1901_v63 = vadd.f32 %v1900_v54, %v1894_v62 }
0x1116   :  { %v1902_v0 = vrot.slane %v1901_v63, 4 }
0x1118   :  { %v1903_v45 = vadd.f32 %v1902_v0, %v1901_v63 }
0x111a   :  { %v1904_v1 = vrot.slane %v1903_v45, 2 }
0x111c   :  { %v1905_v7 = vadd.f32 %v1904_v1, %v1903_v45 }
0x111e   :  { %v1906_v4 = vrot.slane %v1905_v7, 1 }
0x1120   :  { %v1907_v9 = vadd.f32 %v1906_v4, %v1905_v7 }
0x1122   :  { %v1908_v37 = vmul.f32 0.00048828125, %v1907_v9 }
0x1124   :  { %v1910_v10 = vsub.f32 %v1864_v28, %v1908_v37  ;;  %v1909_v13 = vsub.f32 %v1863_v36, %v1908_v37  ;;  %v1912_v14 = vsub.f32 %v1866_v21, %v1908_v37  ;;  %v1911_v26 = vsub.f32 %v1865_v2, %v1908_v37 }
0x1125   :  { %v1914_v19 = vsub.f32 %v1868_v44, %v1908_v37  ;;  %v1913_v34 = vsub.f32 %v1867_v43, %v1908_v37  ;;  %v1916_v27 = vsub.f32 %v1870_v55, %v1908_v37  ;;  %v1915_v30 = vsub.f32 %v1869_v46, %v1908_v37 }
0x1126   :  { %v1918_v33 = vmul.f32 %v1910_v10, %v1910_v10  ;;  %v1917_v15 = vmul.f32 %v1909_v13, %v1909_v13  ;;  %v1920_v23 = vmul.f32 %v1912_v14, %v1912_v14  ;;  %v1919_v18 = vmul.f32 %v1911_v26, %v1911_v26 }
0x1127   :  { %v1922_v22 = vmul.f32 %v1914_v19, %v1914_v19  ;;  %v1921_v35 = vmul.f32 %v1913_v34, %v1913_v34  ;;  %v1924_v28 = vmul.f32 %v1916_v27, %v1916_v27  ;;  %v1923_v2 = vmul.f32 %v1915_v30, %v1915_v30 }
0x1128   :  { %v1928_v20 = vsel %vm92_vm0, %v1918_v33, 0.0  ;;  %v1925_v29 = vsel %vm92_vm0, %v1917_v15, 0.0  ;;  %v1934_v31 = vsel %vm92_vm0, %v1920_v23, 0.0  ;;  %v1931_v32 = vsel %vm92_vm0, %v1919_v18, 0.0 }
0x1129   :  { %1929 = vadd.xlane.f32.xlu0 %v1928_v20  ;;  %1926 = vadd.xlane.f32.xlu1 %v1925_v29  ;;  %v1940_v36 = vsel %vm92_vm0, %v1922_v22, 0.0  ;;  %v1937_v25 = vsel %vm92_vm0, %v1921_v35, 0.0  ;;  %v1946_v38 = vsel %vm92_vm0, %v1924_v28, 0.0  ;;  %v1943_v3 = vsel %vm92_vm0, %v1923_v2, 0.0 }
0x112d   :  { %1935 = vadd.xlane.f32.xlu0 %v1934_v31  ;;  %1932 = vadd.xlane.f32.xlu1 %v1931_v32 }
0x1131   :  { %1941 = vadd.xlane.f32.xlu0 %v1940_v36  ;;  %1938 = vadd.xlane.f32.xlu1 %v1937_v25 }
0x1135   :  { %1947 = vadd.xlane.f32.xlu0 %v1946_v38  ;;  %1944 = vadd.xlane.f32.xlu1 %v1943_v3 }
0x11b6   :  { %v1930_v21 = vpop.xlane.xlu0 %1929  ;;  %v1927_v5 = vpop.xlane.xlu1 %1926 }
0x11b7   :  { %v1949_v16 = vadd.f32 %v1930_v21, %v1927_v5 }
0x11ba   :  { %v1936_v24 = vpop.xlane.xlu0 %1935  ;;  %v1933_v40 = vpop.xlane.xlu1 %1932 }
0x11bb   :  { %v1950_v41 = vadd.f32 %v1949_v16, %v1933_v40 }
0x11bd   :  { %v1951_v42 = vadd.f32 %v1950_v41, %v1936_v24 }
0x11be   :  { %v1942_v39 = vpop.xlane.xlu0 %1941  ;;  %v1939_v11 = vpop.xlane.xlu1 %1938 }
0x11bf   :  { %v1952_v6 = vadd.f32 %v1951_v42, %v1939_v11 }
0x11c1   :  { %v1953_v43 = vadd.f32 %v1952_v6, %v1942_v39 }
0x11c2   :  { %v1945_v52 = vpop.xlane.xlu1 %1944  ;;  %v1948_v46 = vpop.xlane.xlu0 %1947 }
0x11c3   :  { %v1954_v44 = vadd.f32 %v1953_v43, %v1945_v52 }
0x11c5   :  { %v1955_v47 = vadd.f32 %v1954_v44, %v1948_v46 }
0x11c7   :  { %v1956_v55 = vrot.slane %v1955_v47, 4 }
0x11c9   :  { %v1957_v56 = vadd.f32 %v1956_v55, %v1955_v47 }
0x11cb   :  { %v1958_v57 = vrot.slane %v1957_v56, 2 }
0x11cd   :  { %v1959_v17 = vadd.f32 %v1958_v57, %v1957_v56 }
0x11cf   :  { %v1960_v48 = vrot.slane %v1959_v17, 1 }
0x11d1   :  { %v1961_v49 = vadd.f32 %v1960_v48, %v1959_v17 }
0x11d3   :  { %v1962_v58 = vmul.f32 0.00048828125, %v1961_v49 }
0x11d5   :  { %v1963_v50 = vadd.f32 1e-05, %v1962_v58 }
0x11d7   :  { %2518 = vrsqrt.f32 %v1963_v50 }
0x11e1   :  { %v2519_v8 = vpop.eup %2518 }
0x11e2   :  { %v1965_v51 = vmul.f32 %v2519_v8, %v1909_v13  ;;  %v1966_v53 = vmul.f32 %v2519_v8, %v1910_v10  ;;  %v1967_v12 = vmul.f32 %v2519_v8, %v1911_v26  ;;  %v1968_v59 = vmul.f32 %v2519_v8, %v1912_v14 }
0x11e3   :  { %v1969_v60 = vmul.f32 %v2519_v8, %v1913_v34  ;;  %v1970_v61 = vmul.f32 %v2519_v8, %v1914_v19  ;;  %v1971_v54 = vmul.f32 %v2519_v8, %v1915_v30  ;;  %v1972_v62 = vmul.f32 %v2519_v8, %v1916_v27 }
0x11e4   :  { %1973 = vst.msk [vmem:[%s3242_s13] sm:$0xff] %vm92_vm0, %v1965_v51  ;;  %1974 = vst.msk [vmem:[%s3242_s13 + $0x8] sm:$0xff] %vm92_vm0, %v1966_v53 }
0x11e5   :  { %1975 = vst.msk [vmem:[%s3242_s13 + $0x10] sm:$0xff] %vm92_vm0, %v1967_v12  ;;  %1976 = vst.msk [vmem:[%s3242_s13 + $0x18] sm:$0xff] %vm92_vm0, %v1968_v59 }
0x11e6   :  { %1977 = vst.msk [vmem:[%s3242_s13 + $0x20] sm:$0xff] %vm92_vm0, %v1969_v60  ;;  %1978 = vst.msk [vmem:[%s3242_s13 + $0x28] sm:$0xff] %vm92_vm0, %v1970_v61 }
0x11e7   :  { %1979 = vst.msk [vmem:[%s3242_s13 + $0x30] sm:$0xff] %vm92_vm0, %v1971_v54  ;;  %1980 = vst.msk [vmem:[%s3242_s13 + $0x38] sm:$0xff] %vm92_vm0, %v1972_v62 }

</bundles_post_ra>
